<compile_context>
chip_gen: v7x
topology: tpu7x:2x2x1
jax: 0.10.0
libtpu: 0.0.40
codegen_flags: <defaults>
</compile_context>

<pallas_src>
import functools

import numpy as np
import jax
import jax.numpy as jnp
from jax.experimental import pallas as pl
from jax.experimental.pallas import tpu as pltpu


# ----------------------------------------------------------------------------
# Fused kernel: stacked LSTM + (pre-folded) weighted flatten + fc1 + relu + fc2
# ----------------------------------------------------------------------------
def _fused_forward_kernel(x_ref, static_ref, *rest,
                          num_layers, seq_len, hidden, batch_padded):
    # x_ref      : (T*Bp, D_in)  rows ordered (t, b)
    # static_ref : (Bp, S)
    # rest       : [ (wih, whh, b) * L, w1seq, w1st, b1, w2, b2,
    #                out, xproj_scratch, hseq_scratch, flat_scratch ]
    lstm_refs = rest[:3 * num_layers]
    (w1seq_ref, w1st_ref, b1_ref, w2_ref, b2_ref,
     out_ref, xproj_ref, hseq_ref, flat_ref) = rest[3 * num_layers:]

    T, H, Bp = seq_len, hidden, batch_padded

    # Hoisted per-lane constants for the single-tanh gate activation
    # (JAX does not CSE broadcast_in_dim, so build the full (Bp,4H) once):
    #   i/f/o lanes: sigmoid(x) = 0.5 * tanh(0.5 * x) + 0.5
    #   g lanes    : tanh(x)    = 1.0 * tanh(1.0 * x) + 0.0
    lane = jax.lax.broadcasted_iota(jnp.int32, (Bp, 4 * H), 1)
    is_g = (lane >= 2 * H) & (lane < 3 * H)
    pre = jnp.where(is_g, 1.0, 0.5).astype(jnp.float32)
    a_mul = jnp.where(is_g, 1.0, 0.5).astype(jnp.float32)
    b_add = jnp.where(is_g, 0.0, 0.5).astype(jnp.float32)

    for l in range(num_layers):
        wih = lstm_refs[3 * l][...]           # (D_in, 4H)
        whh = lstm_refs[3 * l + 1][...]       # (H, 4H)   resident across steps
        b = lstm_refs[3 * l + 2][...]         # (1, 4H)

        # Batched input projection, hoisted out of the serial recurrence.
        # Rows stay (t, b)-ordered, so the per-step slice below is one aligned
        # 8-sublane x 128-lane tile read.
        src = x_ref[...] if l == 0 else hseq_ref[...]
        xproj_ref[...] = jnp.dot(src, wih,
                                 preferred_element_type=jnp.float32) + b

        h = jnp.zeros((Bp, H), jnp.float32)
        c = jnp.zeros((Bp, H), jnp.float32)
        last = (l + 1 == num_layers)
        for t in range(T):                    # static unroll (T = 8)
            gates = xproj_ref[t * Bp:(t + 1) * Bp, :] + jnp.dot(
                h, whh, preferred_element_type=jnp.float32)      # (Bp, 4H)
            # Single lane-dense tanh on the EUP covers all four gates.
            act = jnp.tanh(gates * pre) * a_mul + b_add
            i_g = act[:, 0 * H:1 * H]
            f_g = act[:, 1 * H:2 * H]
            g_g = act[:, 2 * H:3 * H]
            o_g = act[:, 3 * H:4 * H]
            c = f_g * c + i_g * g_g
            h = o_g * jnp.tanh(c)
            # Per-step writeback bounds vreg live ranges.
            if last:
                flat_ref[:, t * H:(t + 1) * H] = h      # lane-dense flatten
            else:
                hseq_ref[t * Bp:(t + 1) * Bp, :] = h    # next layer's input

    # Head: step weights are already folded into w1seq rows, so this is a
    # single lane-dense (Bp, T*H) @ (T*H, FC) matmul + the static-feature
    # slice of fc1 (no in-kernel concat, no per-call weighting multiply).
    hfc = (jnp.dot(flat_ref[...], w1seq_ref[...],
                   preferred_element_type=jnp.float32)
           + jnp.dot(static_ref[...], w1st_ref[...],
                     preferred_element_type=jnp.float32)
           + b1_ref[...])
    hfc = jnp.maximum(hfc, 0.0)               # relu
    out_ref[...] = (jnp.dot(hfc, w2_ref[...],
                            preferred_element_type=jnp.float32)
                    + b2_ref[...])


# ----------------------------------------------------------------------------
# Parameters, one-time prepare (step-weight fold), forward wrapper.
# ----------------------------------------------------------------------------
def init_params(key, input_size, hidden, num_layers, output_size,
                static_size, seq_len, fc_layer):
    params = {"lstm": []}
    k = key
    kinv = 1.0 / np.sqrt(hidden)
    for layer in range(num_layers):
        d_in = input_size if layer == 0 else hidden
        k, k1, k2, k3 = jax.random.split(k, 4)
        params["lstm"].append(dict(
            wih=jax.random.uniform(k1, (d_in, 4 * hidden), jnp.float32, -kinv, kinv),
            whh=jax.random.uniform(k2, (hidden, 4 * hidden), jnp.float32, -kinv, kinv),
            # NOTE: PyTorch nn.LSTM has b_ih + b_hh; a single combined bias is
            # equivalent (real checkpoints must be imported with the two summed).
            b=jax.random.uniform(k3, (1, 4 * hidden), jnp.float32, -kinv, kinv),
        ))
    k, k1, k2, k3, k4, k5 = jax.random.split(k, 6)
    fan1 = 1.0 / np.sqrt(hidden * seq_len + static_size)
    fan2 = 1.0 / np.sqrt(fc_layer)
    params["w1seq"] = jax.random.uniform(k1, (seq_len * hidden, fc_layer),
                                         jnp.float32, -fan1, fan1)
    params["w1st"] = jax.random.uniform(k2, (static_size, fc_layer),
                                        jnp.float32, -fan1, fan1)
    params["b1"] = jax.random.uniform(k3, (1, fc_layer), jnp.float32, -fan1, fan1)
    params["w2"] = jax.random.uniform(k4, (fc_layer, output_size),
                                      jnp.float32, -fan2, fan2)
    params["b2"] = jax.random.uniform(k5, (1, output_size), jnp.float32, -fan2, fan2)
    return params


def prepare_params(params, *, hidden, seq_len, weight=3, linear=True):
    """One-time init-side fold of the linspace/pow step weights into w1seq."""
    if linear:
        step = np.linspace(1.0, float(weight), seq_len, dtype=np.float32)
    else:
        step = np.float32(weight) ** np.arange(seq_len, dtype=np.float32)
    scale = jnp.asarray(np.repeat(step, hidden)[:, None], jnp.float32)  # (T*H, 1)
    prepared = dict(params)
    prepared["w1seq"] = params["w1seq"] * scale
    return prepared


def hybrid_weighted_lstm_forward(params, sequence, static_features, *, hidden):
    """Fused forward. `params` must come from prepare_params (folded w1seq).

    sequence: (B, T, input_size) batch-first (PyTorch convention).
    """
    B, T, D = sequence.shape
    H = hidden
    num_layers = len(params["lstm"])
    out_size = params["w2"].shape[1]
    Bp = ((B + 7) // 8) * 8                   # fill the 8-sublane dimension

    # (B, T, D) -> (T, Bp, D) -> (T*Bp, D): rows ordered (t, b) so every
    # per-step slice inside the kernel is a contiguous, aligned tile.
    seq_tb = jnp.transpose(sequence.astype(jnp.float32), (1, 0, 2))
    static_p = static_features.astype(jnp.float32)
    if Bp != B:
        seq_tb = jnp.pad(seq_tb, ((0, 0), (0, Bp - B), (0, 0)))
        static_p = jnp.pad(static_p, ((0, Bp - B), (0, 0)))
    x2d = seq_tb.reshape(T * Bp, D)

    args = [x2d, static_p]
    for lp in params["lstm"]:
        args += [lp["wih"], lp["whh"], lp["b"]]
    args += [params["w1seq"], params["w1st"], params["b1"],
             params["w2"], params["b2"]]

    kern = functools.partial(_fused_forward_kernel, num_layers=num_layers,
                             seq_len=T, hidden=H, batch_padded=Bp)
    out_p = pl.pallas_call(
        kern,
        out_shape=jax.ShapeDtypeStruct((Bp, out_size), jnp.float32),
        in_specs=[pl.BlockSpec(memory_space=pltpu.MemorySpace.VMEM)] * len(args),
        out_specs=pl.BlockSpec(memory_space=pltpu.MemorySpace.VMEM),
        scratch_shapes=[pltpu.VMEM((T * Bp, 4 * H), jnp.float32),  # xproj
                        pltpu.VMEM((T * Bp, H), jnp.float32),      # next-layer in
                        pltpu.VMEM((Bp, T * H), jnp.float32)],     # flatten
    )(*args)
    return out_p[:B]


# Pure-JAX reference (mirrors the PyTorch math, uses UNfolded params).
def reference_forward(params, sequence, static_features, *, hidden,
                      weight=3, linear=True):
    B, T, _ = sequence.shape
    x = sequence.astype(jnp.float32)
    for lp in params["lstm"]:
        h = jnp.zeros((B, hidden), jnp.float32)
        c = jnp.zeros((B, hidden), jnp.float32)
        outs = []
        for t in range(T):
            gates = x[:, t, :] @ lp["wih"] + h @ lp["whh"] + lp["b"]
            i = jax.nn.sigmoid(gates[:, :hidden])
            f = jax.nn.sigmoid(gates[:, hidden:2 * hidden])
            g = jnp.tanh(gates[:, 2 * hidden:3 * hidden])
            o = jax.nn.sigmoid(gates[:, 3 * hidden:])
            c = f * c + i * g
            h = o * jnp.tanh(c)
            outs.append(h)
        x = jnp.stack(outs, axis=1)                      # (B, T, H)
    w = (jnp.linspace(1.0, float(weight), T) if linear
         else jnp.float32(weight) ** jnp.arange(T, dtype=jnp.float32))
    weighted = x * w[None, :, None]
    flat = weighted.reshape(B, -1)                       # (B, T*H)
    w1_full = jnp.concatenate([params["w1seq"], params["w1st"]], axis=0)
    combined = jnp.concatenate([flat, static_features.astype(jnp.float32)], axis=1)
    hfc = jnp.maximum(combined @ w1_full + params["b1"], 0.0)
    return hfc @ params["w2"] + params["b2"]


if __name__ == "__main__":
    # Small config consistent with the module.
    B, input_size, hidden, num_layers = 2, 4, 32, 2
    output_size, static_size, seq_len, fc_layer = 3, 4, 8, 64
    weight_factor, linear = 3, True

    key = jax.random.PRNGKey(0)
    kp, ks, kf = jax.random.split(key, 3)
    params = init_params(kp, input_size, hidden, num_layers, output_size,
                         static_size, seq_len, fc_layer)
    kparams = prepare_params(params, hidden=hidden, seq_len=seq_len,
                             weight=weight_factor, linear=linear)
    sequence = jax.random.normal(ks, (B, seq_len, input_size), jnp.float32)
    static_features = jax.random.normal(kf, (B, static_size), jnp.float32)

    out = hybrid_weighted_lstm_forward(kparams, sequence, static_features,
                                       hidden=hidden)
    out = jax.block_until_ready(out)

    ref = reference_forward(params, sequence, static_features, hidden=hidden,
                            weight=weight_factor, linear=linear)
    assert out.shape == (B, output_size)
    np.testing.assert_allclose(np.asarray(out), np.asarray(ref),
                               rtol=1e-4, atol=1e-4)
    print("KERNEL_OK")
</pallas_src>

<mosaic_0001>
module attributes {stable_mosaic.version = 11 : i64} {
  func.func @_fused_forward_kernel(%arg0: memref<64x4xf32, #tpu.memory_space<vmem>>, %arg1: memref<8x4xf32, #tpu.memory_space<vmem>>, %arg2: memref<4x128xf32, #tpu.memory_space<vmem>>, %arg3: memref<32x128xf32, #tpu.memory_space<vmem>>, %arg4: memref<1x128xf32, #tpu.memory_space<vmem>>, %arg5: memref<32x128xf32, #tpu.memory_space<vmem>>, %arg6: memref<32x128xf32, #tpu.memory_space<vmem>>, %arg7: memref<1x128xf32, #tpu.memory_space<vmem>>, %arg8: memref<256x64xf32, #tpu.memory_space<vmem>>, %arg9: memref<4x64xf32, #tpu.memory_space<vmem>>, %arg10: memref<1x64xf32, #tpu.memory_space<vmem>>, %arg11: memref<64x3xf32, #tpu.memory_space<vmem>>, %arg12: memref<1x3xf32, #tpu.memory_space<vmem>>, %arg13: memref<8x3xf32, #tpu.memory_space<vmem>>, %arg14: memref<64x128xf32, #tpu.memory_space<vmem>>, %arg15: memref<64x32xf32, #tpu.memory_space<vmem>>, %arg16: memref<8x256xf32, #tpu.memory_space<vmem>>) attributes {dimension_semantics = [], scalar_prefetch = 0 : i64, scratch_operands = 3 : i64, tpu.core_type = #tpu.core_type<tc>} {
    %0 = tpu.iota {dimensions = array<i32: 1>} : vector<8x128xi32>
    %c64_i32 = arith.constant 64 : i32
    %1 = vector.broadcast %c64_i32 : i32 to vector<8x128xi32>
    %2 = arith.cmpi sge, %0, %1 : vector<8x128xi32>
    %c96_i32 = arith.constant 96 : i32
    %3 = vector.broadcast %c96_i32 : i32 to vector<8x128xi32>
    %4 = arith.cmpi slt, %0, %3 : vector<8x128xi32>
    %5 = arith.andi %2, %4 : vector<8x128xi1>
    %cst = arith.constant 1.000000e+00 : f32
    %cst_0 = arith.constant 5.000000e-01 : f32
    %6 = vector.broadcast %cst : f32 to vector<8x128xf32>
    %7 = vector.broadcast %cst_0 : f32 to vector<8x128xf32>
    %8 = arith.select %5, %6, %7 : vector<8x128xi1>, vector<8x128xf32>
    %cst_1 = arith.constant 1.000000e+00 : f32
    %cst_2 = arith.constant 5.000000e-01 : f32
    %9 = vector.broadcast %cst_1 : f32 to vector<8x128xf32>
    %10 = vector.broadcast %cst_2 : f32 to vector<8x128xf32>
    %11 = arith.select %5, %9, %10 : vector<8x128xi1>, vector<8x128xf32>
    %cst_3 = arith.constant 0.000000e+00 : f32
    %cst_4 = arith.constant 5.000000e-01 : f32
    %12 = vector.broadcast %cst_3 : f32 to vector<8x128xf32>
    %13 = vector.broadcast %cst_4 : f32 to vector<8x128xf32>
    %14 = arith.select %5, %12, %13 : vector<8x128xi1>, vector<8x128xf32>
    %c0 = arith.constant 0 : index
    %c0_5 = arith.constant 0 : index
    %15 = vector.load %arg2[%c0, %c0_5] : memref<4x128xf32, #tpu.memory_space<vmem>>, vector<4x128xf32>
    %c0_6 = arith.constant 0 : index
    %c0_7 = arith.constant 0 : index
    %16 = vector.load %arg3[%c0_6, %c0_7] : memref<32x128xf32, #tpu.memory_space<vmem>>, vector<32x128xf32>
    %c0_8 = arith.constant 0 : index
    %c0_9 = arith.constant 0 : index
    %17 = vector.load %arg4[%c0_8, %c0_9] : memref<1x128xf32, #tpu.memory_space<vmem>>, vector<1x128xf32>
    %c0_10 = arith.constant 0 : index
    %c0_11 = arith.constant 0 : index
    %18 = vector.load %arg0[%c0_10, %c0_11] : memref<64x4xf32, #tpu.memory_space<vmem>>, vector<64x4xf32>
    %cst_12 = arith.constant dense<0.000000e+00> : vector<64x128xf32>
    %19 = tpu.matmul %18, %15, %cst_12 {dimension_numbers = #tpu.dot_dimension_numbers<[1], [0], [0], [1], [0, 0, 1, 1], [], []>} : vector<64x4xf32>, vector<4x128xf32>, vector<64x128xf32> -> vector<64x128xf32>
    %20 = vector.broadcast %17 : vector<1x128xf32> to vector<64x128xf32>
    %21 = arith.addf %19, %20 : vector<64x128xf32>
    %c0_13 = arith.constant 0 : index
    %c0_14 = arith.constant 0 : index
    %22 = vector.load %arg14[%c0_13, %c0_14] : memref<64x128xf32, #tpu.memory_space<vmem>>, vector<64x128xf32>
    tpu.vector_store %arg14[%c0_13, %c0_14], %21 {strides = array<i32>} : memref<64x128xf32, #tpu.memory_space<vmem>>, vector<64x128xf32>,
    %cst_15 = arith.constant 0.000000e+00 : f32
    %23 = vector.broadcast %cst_15 : f32 to vector<8x32xf32>
    %cst_16 = arith.constant 0.000000e+00 : f32
    %24 = vector.broadcast %cst_16 : f32 to vector<8x32xf32>
    %c0_17 = arith.constant 0 : index
    %c0_18 = arith.constant 0 : index
    %25 = vector.load %arg14[%c0_17, %c0_18] : memref<64x128xf32, #tpu.memory_space<vmem>>, vector<8x128xf32>
    %cst_19 = arith.constant dense<0.000000e+00> : vector<8x128xf32>
    %26 = tpu.matmul %23, %16, %cst_19 {dimension_numbers = #tpu.dot_dimension_numbers<[1], [0], [0], [1], [0, 0, 1, 1], [], []>} : vector<8x32xf32>, vector<32x128xf32>, vector<8x128xf32> -> vector<8x128xf32>
    %27 = arith.addf %25, %26 : vector<8x128xf32>
    %28 = arith.mulf %27, %8 : vector<8x128xf32>
    %29 = math.tanh %28 : vector<8x128xf32>
    %30 = arith.mulf %29, %11 : vector<8x128xf32>
    %31 = arith.addf %30, %14 : vector<8x128xf32>
    %32 = vector.extract_strided_slice %31 {offsets = [0, 0], sizes = [8, 32], strides = [1, 1]} : vector<8x128xf32> to vector<8x32xf32>
    %33 = vector.extract_strided_slice %31 {offsets = [0, 32], sizes = [8, 32], strides = [1, 1]} : vector<8x128xf32> to vector<8x32xf32>
    %34 = vector.extract_strided_slice %31 {offsets = [0, 64], sizes = [8, 32], strides = [1, 1]} : vector<8x128xf32> to vector<8x32xf32>
    %35 = vector.extract_strided_slice %31 {offsets = [0, 96], sizes = [8, 32], strides = [1, 1]} : vector<8x128xf32> to vector<8x32xf32>
    %36 = arith.mulf %33, %24 : vector<8x32xf32>
    %37 = arith.mulf %32, %34 : vector<8x32xf32>
    %38 = arith.addf %36, %37 : vector<8x32xf32>
    %39 = math.tanh %38 : vector<8x32xf32>
    %40 = arith.mulf %35, %39 : vector<8x32xf32>
    %c0_20 = arith.constant 0 : index
    %c0_21 = arith.constant 0 : index
    %41 = vector.load %arg15[%c0_20, %c0_21] : memref<64x32xf32, #tpu.memory_space<vmem>>, vector<8x32xf32>
    tpu.vector_store %arg15[%c0_20, %c0_21], %40 {strides = array<i32>} : memref<64x32xf32, #tpu.memory_space<vmem>>, vector<8x32xf32>,
    %c8 = arith.constant 8 : index
    %c0_22 = arith.constant 0 : index
    %42 = vector.load %arg14[%c8, %c0_22] : memref<64x128xf32, #tpu.memory_space<vmem>>, vector<8x128xf32>
    %cst_23 = arith.constant dense<0.000000e+00> : vector<8x128xf32>
    %43 = tpu.matmul %40, %16, %cst_23 {dimension_numbers = #tpu.dot_dimension_numbers<[1], [0], [0], [1], [0, 0, 1, 1], [], []>} : vector<8x32xf32>, vector<32x128xf32>, vector<8x128xf32> -> vector<8x128xf32>
    %44 = arith.addf %42, %43 : vector<8x128xf32>
    %45 = arith.mulf %44, %8 : vector<8x128xf32>
    %46 = math.tanh %45 : vector<8x128xf32>
    %47 = arith.mulf %46, %11 : vector<8x128xf32>
    %48 = arith.addf %47, %14 : vector<8x128xf32>
    %49 = vector.extract_strided_slice %48 {offsets = [0, 0], sizes = [8, 32], strides = [1, 1]} : vector<8x128xf32> to vector<8x32xf32>
    %50 = vector.extract_strided_slice %48 {offsets = [0, 32], sizes = [8, 32], strides = [1, 1]} : vector<8x128xf32> to vector<8x32xf32>
    %51 = vector.extract_strided_slice %48 {offsets = [0, 64], sizes = [8, 32], strides = [1, 1]} : vector<8x128xf32> to vector<8x32xf32>
    %52 = vector.extract_strided_slice %48 {offsets = [0, 96], sizes = [8, 32], strides = [1, 1]} : vector<8x128xf32> to vector<8x32xf32>
    %53 = arith.mulf %50, %38 : vector<8x32xf32>
    %54 = arith.mulf %49, %51 : vector<8x32xf32>
    %55 = arith.addf %53, %54 : vector<8x32xf32>
    %56 = math.tanh %55 : vector<8x32xf32>
    %57 = arith.mulf %52, %56 : vector<8x32xf32>
    %c8_24 = arith.constant 8 : index
    %c0_25 = arith.constant 0 : index
    %58 = vector.load %arg15[%c8_24, %c0_25] : memref<64x32xf32, #tpu.memory_space<vmem>>, vector<8x32xf32>
    tpu.vector_store %arg15[%c8_24, %c0_25], %57 {strides = array<i32>} : memref<64x32xf32, #tpu.memory_space<vmem>>, vector<8x32xf32>,
    %c16 = arith.constant 16 : index
    %c0_26 = arith.constant 0 : index
    %59 = vector.load %arg14[%c16, %c0_26] : memref<64x128xf32, #tpu.memory_space<vmem>>, vector<8x128xf32>
    %cst_27 = arith.constant dense<0.000000e+00> : vector<8x128xf32>
    %60 = tpu.matmul %57, %16, %cst_27 {dimension_numbers = #tpu.dot_dimension_numbers<[1], [0], [0], [1], [0, 0, 1, 1], [], []>} : vector<8x32xf32>, vector<32x128xf32>, vector<8x128xf32> -> vector<8x128xf32>
    %61 = arith.addf %59, %60 : vector<8x128xf32>
    %62 = arith.mulf %61, %8 : vector<8x128xf32>
    %63 = math.tanh %62 : vector<8x128xf32>
    %64 = arith.mulf %63, %11 : vector<8x128xf32>
    %65 = arith.addf %64, %14 : vector<8x128xf32>
    %66 = vector.extract_strided_slice %65 {offsets = [0, 0], sizes = [8, 32], strides = [1, 1]} : vector<8x128xf32> to vector<8x32xf32>
    %67 = vector.extract_strided_slice %65 {offsets = [0, 32], sizes = [8, 32], strides = [1, 1]} : vector<8x128xf32> to vector<8x32xf32>
    %68 = vector.extract_strided_slice %65 {offsets = [0, 64], sizes = [8, 32], strides = [1, 1]} : vector<8x128xf32> to vector<8x32xf32>
    %69 = vector.extract_strided_slice %65 {offsets = [0, 96], sizes = [8, 32], strides = [1, 1]} : vector<8x128xf32> to vector<8x32xf32>
    %70 = arith.mulf %67, %55 : vector<8x32xf32>
    %71 = arith.mulf %66, %68 : vector<8x32xf32>
    %72 = arith.addf %70, %71 : vector<8x32xf32>
    %73 = math.tanh %72 : vector<8x32xf32>
    %74 = arith.mulf %69, %73 : vector<8x32xf32>
    %c16_28 = arith.constant 16 : index
    %c0_29 = arith.constant 0 : index
    %75 = vector.load %arg15[%c16_28, %c0_29] : memref<64x32xf32, #tpu.memory_space<vmem>>, vector<8x32xf32>
    tpu.vector_store %arg15[%c16_28, %c0_29], %74 {strides = array<i32>} : memref<64x32xf32, #tpu.memory_space<vmem>>, vector<8x32xf32>,
    %c24 = arith.constant 24 : index
    %c0_30 = arith.constant 0 : index
    %76 = vector.load %arg14[%c24, %c0_30] : memref<64x128xf32, #tpu.memory_space<vmem>>, vector<8x128xf32>
    %cst_31 = arith.constant dense<0.000000e+00> : vector<8x128xf32>
    %77 = tpu.matmul %74, %16, %cst_31 {dimension_numbers = #tpu.dot_dimension_numbers<[1], [0], [0], [1], [0, 0, 1, 1], [], []>} : vector<8x32xf32>, vector<32x128xf32>, vector<8x128xf32> -> vector<8x128xf32>
    %78 = arith.addf %76, %77 : vector<8x128xf32>
    %79 = arith.mulf %78, %8 : vector<8x128xf32>
    %80 = math.tanh %79 : vector<8x128xf32>
    %81 = arith.mulf %80, %11 : vector<8x128xf32>
    %82 = arith.addf %81, %14 : vector<8x128xf32>
    %83 = vector.extract_strided_slice %82 {offsets = [0, 0], sizes = [8, 32], strides = [1, 1]} : vector<8x128xf32> to vector<8x32xf32>
    %84 = vector.extract_strided_slice %82 {offsets = [0, 32], sizes = [8, 32], strides = [1, 1]} : vector<8x128xf32> to vector<8x32xf32>
    %85 = vector.extract_strided_slice %82 {offsets = [0, 64], sizes = [8, 32], strides = [1, 1]} : vector<8x128xf32> to vector<8x32xf32>
    %86 = vector.extract_strided_slice %82 {offsets = [0, 96], sizes = [8, 32], strides = [1, 1]} : vector<8x128xf32> to vector<8x32xf32>
    %87 = arith.mulf %84, %72 : vector<8x32xf32>
    %88 = arith.mulf %83, %85 : vector<8x32xf32>
    %89 = arith.addf %87, %88 : vector<8x32xf32>
    %90 = math.tanh %89 : vector<8x32xf32>
    %91 = arith.mulf %86, %90 : vector<8x32xf32>
    %c24_32 = arith.constant 24 : index
    %c0_33 = arith.constant 0 : index
    %92 = vector.load %arg15[%c24_32, %c0_33] : memref<64x32xf32, #tpu.memory_space<vmem>>, vector<8x32xf32>
    tpu.vector_store %arg15[%c24_32, %c0_33], %91 {strides = array<i32>} : memref<64x32xf32, #tpu.memory_space<vmem>>, vector<8x32xf32>,
    %c32 = arith.constant 32 : index
    %c0_34 = arith.constant 0 : index
    %93 = vector.load %arg14[%c32, %c0_34] : memref<64x128xf32, #tpu.memory_space<vmem>>, vector<8x128xf32>
    %cst_35 = arith.constant dense<0.000000e+00> : vector<8x128xf32>
    %94 = tpu.matmul %91, %16, %cst_35 {dimension_numbers = #tpu.dot_dimension_numbers<[1], [0], [0], [1], [0, 0, 1, 1], [], []>} : vector<8x32xf32>, vector<32x128xf32>, vector<8x128xf32> -> vector<8x128xf32>
    %95 = arith.addf %93, %94 : vector<8x128xf32>
    %96 = arith.mulf %95, %8 : vector<8x128xf32>
    %97 = math.tanh %96 : vector<8x128xf32>
    %98 = arith.mulf %97, %11 : vector<8x128xf32>
    %99 = arith.addf %98, %14 : vector<8x128xf32>
    %100 = vector.extract_strided_slice %99 {offsets = [0, 0], sizes = [8, 32], strides = [1, 1]} : vector<8x128xf32> to vector<8x32xf32>
    %101 = vector.extract_strided_slice %99 {offsets = [0, 32], sizes = [8, 32], strides = [1, 1]} : vector<8x128xf32> to vector<8x32xf32>
    %102 = vector.extract_strided_slice %99 {offsets = [0, 64], sizes = [8, 32], strides = [1, 1]} : vector<8x128xf32> to vector<8x32xf32>
    %103 = vector.extract_strided_slice %99 {offsets = [0, 96], sizes = [8, 32], strides = [1, 1]} : vector<8x128xf32> to vector<8x32xf32>
    %104 = arith.mulf %101, %89 : vector<8x32xf32>
    %105 = arith.mulf %100, %102 : vector<8x32xf32>
    %106 = arith.addf %104, %105 : vector<8x32xf32>
    %107 = math.tanh %106 : vector<8x32xf32>
    %108 = arith.mulf %103, %107 : vector<8x32xf32>
    %c32_36 = arith.constant 32 : index
    %c0_37 = arith.constant 0 : index
    %109 = vector.load %arg15[%c32_36, %c0_37] : memref<64x32xf32, #tpu.memory_space<vmem>>, vector<8x32xf32>
    tpu.vector_store %arg15[%c32_36, %c0_37], %108 {strides = array<i32>} : memref<64x32xf32, #tpu.memory_space<vmem>>, vector<8x32xf32>,
    %c40 = arith.constant 40 : index
    %c0_38 = arith.constant 0 : index
    %110 = vector.load %arg14[%c40, %c0_38] : memref<64x128xf32, #tpu.memory_space<vmem>>, vector<8x128xf32>
    %cst_39 = arith.constant dense<0.000000e+00> : vector<8x128xf32>
    %111 = tpu.matmul %108, %16, %cst_39 {dimension_numbers = #tpu.dot_dimension_numbers<[1], [0], [0], [1], [0, 0, 1, 1], [], []>} : vector<8x32xf32>, vector<32x128xf32>, vector<8x128xf32> -> vector<8x128xf32>
    %112 = arith.addf %110, %111 : vector<8x128xf32>
    %113 = arith.mulf %112, %8 : vector<8x128xf32>
    %114 = math.tanh %113 : vector<8x128xf32>
    %115 = arith.mulf %114, %11 : vector<8x128xf32>
    %116 = arith.addf %115, %14 : vector<8x128xf32>
    %117 = vector.extract_strided_slice %116 {offsets = [0, 0], sizes = [8, 32], strides = [1, 1]} : vector<8x128xf32> to vector<8x32xf32>
    %118 = vector.extract_strided_slice %116 {offsets = [0, 32], sizes = [8, 32], strides = [1, 1]} : vector<8x128xf32> to vector<8x32xf32>
    %119 = vector.extract_strided_slice %116 {offsets = [0, 64], sizes = [8, 32], strides = [1, 1]} : vector<8x128xf32> to vector<8x32xf32>
    %120 = vector.extract_strided_slice %116 {offsets = [0, 96], sizes = [8, 32], strides = [1, 1]} : vector<8x128xf32> to vector<8x32xf32>
    %121 = arith.mulf %118, %106 : vector<8x32xf32>
    %122 = arith.mulf %117, %119 : vector<8x32xf32>
    %123 = arith.addf %121, %122 : vector<8x32xf32>
    %124 = math.tanh %123 : vector<8x32xf32>
    %125 = arith.mulf %120, %124 : vector<8x32xf32>
    %c40_40 = arith.constant 40 : index
    %c0_41 = arith.constant 0 : index
    %126 = vector.load %arg15[%c40_40, %c0_41] : memref<64x32xf32, #tpu.memory_space<vmem>>, vector<8x32xf32>
    tpu.vector_store %arg15[%c40_40, %c0_41], %125 {strides = array<i32>} : memref<64x32xf32, #tpu.memory_space<vmem>>, vector<8x32xf32>,
    %c48 = arith.constant 48 : index
    %c0_42 = arith.constant 0 : index
    %127 = vector.load %arg14[%c48, %c0_42] : memref<64x128xf32, #tpu.memory_space<vmem>>, vector<8x128xf32>
    %cst_43 = arith.constant dense<0.000000e+00> : vector<8x128xf32>
    %128 = tpu.matmul %125, %16, %cst_43 {dimension_numbers = #tpu.dot_dimension_numbers<[1], [0], [0], [1], [0, 0, 1, 1], [], []>} : vector<8x32xf32>, vector<32x128xf32>, vector<8x128xf32> -> vector<8x128xf32>
    %129 = arith.addf %127, %128 : vector<8x128xf32>
    %130 = arith.mulf %129, %8 : vector<8x128xf32>
    %131 = math.tanh %130 : vector<8x128xf32>
    %132 = arith.mulf %131, %11 : vector<8x128xf32>
    %133 = arith.addf %132, %14 : vector<8x128xf32>
    %134 = vector.extract_strided_slice %133 {offsets = [0, 0], sizes = [8, 32], strides = [1, 1]} : vector<8x128xf32> to vector<8x32xf32>
    %135 = vector.extract_strided_slice %133 {offsets = [0, 32], sizes = [8, 32], strides = [1, 1]} : vector<8x128xf32> to vector<8x32xf32>
    %136 = vector.extract_strided_slice %133 {offsets = [0, 64], sizes = [8, 32], strides = [1, 1]} : vector<8x128xf32> to vector<8x32xf32>
    %137 = vector.extract_strided_slice %133 {offsets = [0, 96], sizes = [8, 32], strides = [1, 1]} : vector<8x128xf32> to vector<8x32xf32>
    %138 = arith.mulf %135, %123 : vector<8x32xf32>
    %139 = arith.mulf %134, %136 : vector<8x32xf32>
    %140 = arith.addf %138, %139 : vector<8x32xf32>
    %141 = math.tanh %140 : vector<8x32xf32>
    %142 = arith.mulf %137, %141 : vector<8x32xf32>
    %c48_44 = arith.constant 48 : index
    %c0_45 = arith.constant 0 : index
    %143 = vector.load %arg15[%c48_44, %c0_45] : memref<64x32xf32, #tpu.memory_space<vmem>>, vector<8x32xf32>
    tpu.vector_store %arg15[%c48_44, %c0_45], %142 {strides = array<i32>} : memref<64x32xf32, #tpu.memory_space<vmem>>, vector<8x32xf32>,
    %c56 = arith.constant 56 : index
    %c0_46 = arith.constant 0 : index
    %144 = vector.load %arg14[%c56, %c0_46] : memref<64x128xf32, #tpu.memory_space<vmem>>, vector<8x128xf32>
    %cst_47 = arith.constant dense<0.000000e+00> : vector<8x128xf32>
    %145 = tpu.matmul %142, %16, %cst_47 {dimension_numbers = #tpu.dot_dimension_numbers<[1], [0], [0], [1], [0, 0, 1, 1], [], []>} : vector<8x32xf32>, vector<32x128xf32>, vector<8x128xf32> -> vector<8x128xf32>
    %146 = arith.addf %144, %145 : vector<8x128xf32>
    %147 = arith.mulf %146, %8 : vector<8x128xf32>
    %148 = math.tanh %147 : vector<8x128xf32>
    %149 = arith.mulf %148, %11 : vector<8x128xf32>
    %150 = arith.addf %149, %14 : vector<8x128xf32>
    %151 = vector.extract_strided_slice %150 {offsets = [0, 0], sizes = [8, 32], strides = [1, 1]} : vector<8x128xf32> to vector<8x32xf32>
    %152 = vector.extract_strided_slice %150 {offsets = [0, 32], sizes = [8, 32], strides = [1, 1]} : vector<8x128xf32> to vector<8x32xf32>
    %153 = vector.extract_strided_slice %150 {offsets = [0, 64], sizes = [8, 32], strides = [1, 1]} : vector<8x128xf32> to vector<8x32xf32>
    %154 = vector.extract_strided_slice %150 {offsets = [0, 96], sizes = [8, 32], strides = [1, 1]} : vector<8x128xf32> to vector<8x32xf32>
    %155 = arith.mulf %152, %140 : vector<8x32xf32>
    %156 = arith.mulf %151, %153 : vector<8x32xf32>
    %157 = arith.addf %155, %156 : vector<8x32xf32>
    %158 = math.tanh %157 : vector<8x32xf32>
    %159 = arith.mulf %154, %158 : vector<8x32xf32>
    %c56_48 = arith.constant 56 : index
    %c0_49 = arith.constant 0 : index
    %160 = vector.load %arg15[%c56_48, %c0_49] : memref<64x32xf32, #tpu.memory_space<vmem>>, vector<8x32xf32>
    tpu.vector_store %arg15[%c56_48, %c0_49], %159 {strides = array<i32>} : memref<64x32xf32, #tpu.memory_space<vmem>>, vector<8x32xf32>,
    %c0_50 = arith.constant 0 : index
    %c0_51 = arith.constant 0 : index
    %161 = vector.load %arg5[%c0_50, %c0_51] : memref<32x128xf32, #tpu.memory_space<vmem>>, vector<32x128xf32>
    %c0_52 = arith.constant 0 : index
    %c0_53 = arith.constant 0 : index
    %162 = vector.load %arg6[%c0_52, %c0_53] : memref<32x128xf32, #tpu.memory_space<vmem>>, vector<32x128xf32>
    %c0_54 = arith.constant 0 : index
    %c0_55 = arith.constant 0 : index
    %163 = vector.load %arg7[%c0_54, %c0_55] : memref<1x128xf32, #tpu.memory_space<vmem>>, vector<1x128xf32>
    %c0_56 = arith.constant 0 : index
    %c0_57 = arith.constant 0 : index
    %164 = vector.load %arg15[%c0_56, %c0_57] : memref<64x32xf32, #tpu.memory_space<vmem>>, vector<64x32xf32>
    %cst_58 = arith.constant dense<0.000000e+00> : vector<64x128xf32>
    %165 = tpu.matmul %164, %161, %cst_58 {dimension_numbers = #tpu.dot_dimension_numbers<[1], [0], [0], [1], [0, 0, 1, 1], [], []>} : vector<64x32xf32>, vector<32x128xf32>, vector<64x128xf32> -> vector<64x128xf32>
    %166 = vector.broadcast %163 : vector<1x128xf32> to vector<64x128xf32>
    %167 = arith.addf %165, %166 : vector<64x128xf32>
    %c0_59 = arith.constant 0 : index
    %c0_60 = arith.constant 0 : index
    %168 = vector.load %arg14[%c0_59, %c0_60] : memref<64x128xf32, #tpu.memory_space<vmem>>, vector<64x128xf32>
    tpu.vector_store %arg14[%c0_59, %c0_60], %167 {strides = array<i32>} : memref<64x128xf32, #tpu.memory_space<vmem>>, vector<64x128xf32>,
    %cst_61 = arith.constant 0.000000e+00 : f32
    %169 = vector.broadcast %cst_61 : f32 to vector<8x32xf32>
    %cst_62 = arith.constant 0.000000e+00 : f32
    %170 = vector.broadcast %cst_62 : f32 to vector<8x32xf32>
    %c0_63 = arith.constant 0 : index
    %c0_64 = arith.constant 0 : index
    %171 = vector.load %arg14[%c0_63, %c0_64] : memref<64x128xf32, #tpu.memory_space<vmem>>, vector<8x128xf32>
    %cst_65 = arith.constant dense<0.000000e+00> : vector<8x128xf32>
    %172 = tpu.matmul %169, %162, %cst_65 {dimension_numbers = #tpu.dot_dimension_numbers<[1], [0], [0], [1], [0, 0, 1, 1], [], []>} : vector<8x32xf32>, vector<32x128xf32>, vector<8x128xf32> -> vector<8x128xf32>
    %173 = arith.addf %171, %172 : vector<8x128xf32>
    %174 = arith.mulf %173, %8 : vector<8x128xf32>
    %175 = math.tanh %174 : vector<8x128xf32>
    %176 = arith.mulf %175, %11 : vector<8x128xf32>
    %177 = arith.addf %176, %14 : vector<8x128xf32>
    %178 = vector.extract_strided_slice %177 {offsets = [0, 0], sizes = [8, 32], strides = [1, 1]} : vector<8x128xf32> to vector<8x32xf32>
    %179 = vector.extract_strided_slice %177 {offsets = [0, 32], sizes = [8, 32], strides = [1, 1]} : vector<8x128xf32> to vector<8x32xf32>
    %180 = vector.extract_strided_slice %177 {offsets = [0, 64], sizes = [8, 32], strides = [1, 1]} : vector<8x128xf32> to vector<8x32xf32>
    %181 = vector.extract_strided_slice %177 {offsets = [0, 96], sizes = [8, 32], strides = [1, 1]} : vector<8x128xf32> to vector<8x32xf32>
    %182 = arith.mulf %179, %170 : vector<8x32xf32>
    %183 = arith.mulf %178, %180 : vector<8x32xf32>
    %184 = arith.addf %182, %183 : vector<8x32xf32>
    %185 = math.tanh %184 : vector<8x32xf32>
    %186 = arith.mulf %181, %185 : vector<8x32xf32>
    %c0_66 = arith.constant 0 : index
    %c0_67 = arith.constant 0 : index
    %187 = vector.load %arg16[%c0_66, %c0_67] : memref<8x256xf32, #tpu.memory_space<vmem>>, vector<8x32xf32>
    tpu.vector_store %arg16[%c0_66, %c0_67], %186 {strides = array<i32>} : memref<8x256xf32, #tpu.memory_space<vmem>>, vector<8x32xf32>,
    %c8_68 = arith.constant 8 : index
    %c0_69 = arith.constant 0 : index
    %188 = vector.load %arg14[%c8_68, %c0_69] : memref<64x128xf32, #tpu.memory_space<vmem>>, vector<8x128xf32>
    %cst_70 = arith.constant dense<0.000000e+00> : vector<8x128xf32>
    %189 = tpu.matmul %186, %162, %cst_70 {dimension_numbers = #tpu.dot_dimension_numbers<[1], [0], [0], [1], [0, 0, 1, 1], [], []>} : vector<8x32xf32>, vector<32x128xf32>, vector<8x128xf32> -> vector<8x128xf32>
    %190 = arith.addf %188, %189 : vector<8x128xf32>
    %191 = arith.mulf %190, %8 : vector<8x128xf32>
    %192 = math.tanh %191 : vector<8x128xf32>
    %193 = arith.mulf %192, %11 : vector<8x128xf32>
    %194 = arith.addf %193, %14 : vector<8x128xf32>
    %195 = vector.extract_strided_slice %194 {offsets = [0, 0], sizes = [8, 32], strides = [1, 1]} : vector<8x128xf32> to vector<8x32xf32>
    %196 = vector.extract_strided_slice %194 {offsets = [0, 32], sizes = [8, 32], strides = [1, 1]} : vector<8x128xf32> to vector<8x32xf32>
    %197 = vector.extract_strided_slice %194 {offsets = [0, 64], sizes = [8, 32], strides = [1, 1]} : vector<8x128xf32> to vector<8x32xf32>
    %198 = vector.extract_strided_slice %194 {offsets = [0, 96], sizes = [8, 32], strides = [1, 1]} : vector<8x128xf32> to vector<8x32xf32>
    %199 = arith.mulf %196, %184 : vector<8x32xf32>
    %200 = arith.mulf %195, %197 : vector<8x32xf32>
    %201 = arith.addf %199, %200 : vector<8x32xf32>
    %202 = math.tanh %201 : vector<8x32xf32>
    %203 = arith.mulf %198, %202 : vector<8x32xf32>
    %c0_71 = arith.constant 0 : index
    %c32_72 = arith.constant 32 : index
    %204 = vector.load %arg16[%c0_71, %c32_72] : memref<8x256xf32, #tpu.memory_space<vmem>>, vector<8x32xf32>
    tpu.vector_store %arg16[%c0_71, %c32_72], %203 {strides = array<i32>} : memref<8x256xf32, #tpu.memory_space<vmem>>, vector<8x32xf32>,
    %c16_73 = arith.constant 16 : index
    %c0_74 = arith.constant 0 : index
    %205 = vector.load %arg14[%c16_73, %c0_74] : memref<64x128xf32, #tpu.memory_space<vmem>>, vector<8x128xf32>
    %cst_75 = arith.constant dense<0.000000e+00> : vector<8x128xf32>
    %206 = tpu.matmul %203, %162, %cst_75 {dimension_numbers = #tpu.dot_dimension_numbers<[1], [0], [0], [1], [0, 0, 1, 1], [], []>} : vector<8x32xf32>, vector<32x128xf32>, vector<8x128xf32> -> vector<8x128xf32>
    %207 = arith.addf %205, %206 : vector<8x128xf32>
    %208 = arith.mulf %207, %8 : vector<8x128xf32>
    %209 = math.tanh %208 : vector<8x128xf32>
    %210 = arith.mulf %209, %11 : vector<8x128xf32>
    %211 = arith.addf %210, %14 : vector<8x128xf32>
    %212 = vector.extract_strided_slice %211 {offsets = [0, 0], sizes = [8, 32], strides = [1, 1]} : vector<8x128xf32> to vector<8x32xf32>
    %213 = vector.extract_strided_slice %211 {offsets = [0, 32], sizes = [8, 32], strides = [1, 1]} : vector<8x128xf32> to vector<8x32xf32>
    %214 = vector.extract_strided_slice %211 {offsets = [0, 64], sizes = [8, 32], strides = [1, 1]} : vector<8x128xf32> to vector<8x32xf32>
    %215 = vector.extract_strided_slice %211 {offsets = [0, 96], sizes = [8, 32], strides = [1, 1]} : vector<8x128xf32> to vector<8x32xf32>
    %216 = arith.mulf %213, %201 : vector<8x32xf32>
    %217 = arith.mulf %212, %214 : vector<8x32xf32>
    %218 = arith.addf %216, %217 : vector<8x32xf32>
    %219 = math.tanh %218 : vector<8x32xf32>
    %220 = arith.mulf %215, %219 : vector<8x32xf32>
    %c0_76 = arith.constant 0 : index
    %c64 = arith.constant 64 : index
    %221 = vector.load %arg16[%c0_76, %c64] : memref<8x256xf32, #tpu.memory_space<vmem>>, vector<8x32xf32>
    tpu.vector_store %arg16[%c0_76, %c64], %220 {strides = array<i32>} : memref<8x256xf32, #tpu.memory_space<vmem>>, vector<8x32xf32>,
    %c24_77 = arith.constant 24 : index
    %c0_78 = arith.constant 0 : index
    %222 = vector.load %arg14[%c24_77, %c0_78] : memref<64x128xf32, #tpu.memory_space<vmem>>, vector<8x128xf32>
    %cst_79 = arith.constant dense<0.000000e+00> : vector<8x128xf32>
    %223 = tpu.matmul %220, %162, %cst_79 {dimension_numbers = #tpu.dot_dimension_numbers<[1], [0], [0], [1], [0, 0, 1, 1], [], []>} : vector<8x32xf32>, vector<32x128xf32>, vector<8x128xf32> -> vector<8x128xf32>
    %224 = arith.addf %222, %223 : vector<8x128xf32>
    %225 = arith.mulf %224, %8 : vector<8x128xf32>
    %226 = math.tanh %225 : vector<8x128xf32>
    %227 = arith.mulf %226, %11 : vector<8x128xf32>
    %228 = arith.addf %227, %14 : vector<8x128xf32>
    %229 = vector.extract_strided_slice %228 {offsets = [0, 0], sizes = [8, 32], strides = [1, 1]} : vector<8x128xf32> to vector<8x32xf32>
    %230 = vector.extract_strided_slice %228 {offsets = [0, 32], sizes = [8, 32], strides = [1, 1]} : vector<8x128xf32> to vector<8x32xf32>
    %231 = vector.extract_strided_slice %228 {offsets = [0, 64], sizes = [8, 32], strides = [1, 1]} : vector<8x128xf32> to vector<8x32xf32>
    %232 = vector.extract_strided_slice %228 {offsets = [0, 96], sizes = [8, 32], strides = [1, 1]} : vector<8x128xf32> to vector<8x32xf32>
    %233 = arith.mulf %230, %218 : vector<8x32xf32>
    %234 = arith.mulf %229, %231 : vector<8x32xf32>
    %235 = arith.addf %233, %234 : vector<8x32xf32>
    %236 = math.tanh %235 : vector<8x32xf32>
    %237 = arith.mulf %232, %236 : vector<8x32xf32>
    %c0_80 = arith.constant 0 : index
    %c96 = arith.constant 96 : index
    %238 = vector.load %arg16[%c0_80, %c96] : memref<8x256xf32, #tpu.memory_space<vmem>>, vector<8x32xf32>
    tpu.vector_store %arg16[%c0_80, %c96], %237 {strides = array<i32>} : memref<8x256xf32, #tpu.memory_space<vmem>>, vector<8x32xf32>,
    %c32_81 = arith.constant 32 : index
    %c0_82 = arith.constant 0 : index
    %239 = vector.load %arg14[%c32_81, %c0_82] : memref<64x128xf32, #tpu.memory_space<vmem>>, vector<8x128xf32>
    %cst_83 = arith.constant dense<0.000000e+00> : vector<8x128xf32>
    %240 = tpu.matmul %237, %162, %cst_83 {dimension_numbers = #tpu.dot_dimension_numbers<[1], [0], [0], [1], [0, 0, 1, 1], [], []>} : vector<8x32xf32>, vector<32x128xf32>, vector<8x128xf32> -> vector<8x128xf32>
    %241 = arith.addf %239, %240 : vector<8x128xf32>
    %242 = arith.mulf %241, %8 : vector<8x128xf32>
    %243 = math.tanh %242 : vector<8x128xf32>
    %244 = arith.mulf %243, %11 : vector<8x128xf32>
    %245 = arith.addf %244, %14 : vector<8x128xf32>
    %246 = vector.extract_strided_slice %245 {offsets = [0, 0], sizes = [8, 32], strides = [1, 1]} : vector<8x128xf32> to vector<8x32xf32>
    %247 = vector.extract_strided_slice %245 {offsets = [0, 32], sizes = [8, 32], strides = [1, 1]} : vector<8x128xf32> to vector<8x32xf32>
    %248 = vector.extract_strided_slice %245 {offsets = [0, 64], sizes = [8, 32], strides = [1, 1]} : vector<8x128xf32> to vector<8x32xf32>
    %249 = vector.extract_strided_slice %245 {offsets = [0, 96], sizes = [8, 32], strides = [1, 1]} : vector<8x128xf32> to vector<8x32xf32>
    %250 = arith.mulf %247, %235 : vector<8x32xf32>
    %251 = arith.mulf %246, %248 : vector<8x32xf32>
    %252 = arith.addf %250, %251 : vector<8x32xf32>
    %253 = math.tanh %252 : vector<8x32xf32>
    %254 = arith.mulf %249, %253 : vector<8x32xf32>
    %c0_84 = arith.constant 0 : index
    %c128 = arith.constant 128 : index
    %255 = vector.load %arg16[%c0_84, %c128] : memref<8x256xf32, #tpu.memory_space<vmem>>, vector<8x32xf32>
    tpu.vector_store %arg16[%c0_84, %c128], %254 {strides = array<i32>} : memref<8x256xf32, #tpu.memory_space<vmem>>, vector<8x32xf32>,
    %c40_85 = arith.constant 40 : index
    %c0_86 = arith.constant 0 : index
    %256 = vector.load %arg14[%c40_85, %c0_86] : memref<64x128xf32, #tpu.memory_space<vmem>>, vector<8x128xf32>
    %cst_87 = arith.constant dense<0.000000e+00> : vector<8x128xf32>
    %257 = tpu.matmul %254, %162, %cst_87 {dimension_numbers = #tpu.dot_dimension_numbers<[1], [0], [0], [1], [0, 0, 1, 1], [], []>} : vector<8x32xf32>, vector<32x128xf32>, vector<8x128xf32> -> vector<8x128xf32>
    %258 = arith.addf %256, %257 : vector<8x128xf32>
    %259 = arith.mulf %258, %8 : vector<8x128xf32>
    %260 = math.tanh %259 : vector<8x128xf32>
    %261 = arith.mulf %260, %11 : vector<8x128xf32>
    %262 = arith.addf %261, %14 : vector<8x128xf32>
    %263 = vector.extract_strided_slice %262 {offsets = [0, 0], sizes = [8, 32], strides = [1, 1]} : vector<8x128xf32> to vector<8x32xf32>
    %264 = vector.extract_strided_slice %262 {offsets = [0, 32], sizes = [8, 32], strides = [1, 1]} : vector<8x128xf32> to vector<8x32xf32>
    %265 = vector.extract_strided_slice %262 {offsets = [0, 64], sizes = [8, 32], strides = [1, 1]} : vector<8x128xf32> to vector<8x32xf32>
    %266 = vector.extract_strided_slice %262 {offsets = [0, 96], sizes = [8, 32], strides = [1, 1]} : vector<8x128xf32> to vector<8x32xf32>
    %267 = arith.mulf %264, %252 : vector<8x32xf32>
    %268 = arith.mulf %263, %265 : vector<8x32xf32>
    %269 = arith.addf %267, %268 : vector<8x32xf32>
    %270 = math.tanh %269 : vector<8x32xf32>
    %271 = arith.mulf %266, %270 : vector<8x32xf32>
    %c0_88 = arith.constant 0 : index
    %c160 = arith.constant 160 : index
    %272 = vector.load %arg16[%c0_88, %c160] : memref<8x256xf32, #tpu.memory_space<vmem>>, vector<8x32xf32>
    tpu.vector_store %arg16[%c0_88, %c160], %271 {strides = array<i32>} : memref<8x256xf32, #tpu.memory_space<vmem>>, vector<8x32xf32>,
    %c48_89 = arith.constant 48 : index
    %c0_90 = arith.constant 0 : index
    %273 = vector.load %arg14[%c48_89, %c0_90] : memref<64x128xf32, #tpu.memory_space<vmem>>, vector<8x128xf32>
    %cst_91 = arith.constant dense<0.000000e+00> : vector<8x128xf32>
    %274 = tpu.matmul %271, %162, %cst_91 {dimension_numbers = #tpu.dot_dimension_numbers<[1], [0], [0], [1], [0, 0, 1, 1], [], []>} : vector<8x32xf32>, vector<32x128xf32>, vector<8x128xf32> -> vector<8x128xf32>
    %275 = arith.addf %273, %274 : vector<8x128xf32>
    %276 = arith.mulf %275, %8 : vector<8x128xf32>
    %277 = math.tanh %276 : vector<8x128xf32>
    %278 = arith.mulf %277, %11 : vector<8x128xf32>
    %279 = arith.addf %278, %14 : vector<8x128xf32>
    %280 = vector.extract_strided_slice %279 {offsets = [0, 0], sizes = [8, 32], strides = [1, 1]} : vector<8x128xf32> to vector<8x32xf32>
    %281 = vector.extract_strided_slice %279 {offsets = [0, 32], sizes = [8, 32], strides = [1, 1]} : vector<8x128xf32> to vector<8x32xf32>
    %282 = vector.extract_strided_slice %279 {offsets = [0, 64], sizes = [8, 32], strides = [1, 1]} : vector<8x128xf32> to vector<8x32xf32>
    %283 = vector.extract_strided_slice %279 {offsets = [0, 96], sizes = [8, 32], strides = [1, 1]} : vector<8x128xf32> to vector<8x32xf32>
    %284 = arith.mulf %281, %269 : vector<8x32xf32>
    %285 = arith.mulf %280, %282 : vector<8x32xf32>
    %286 = arith.addf %284, %285 : vector<8x32xf32>
    %287 = math.tanh %286 : vector<8x32xf32>
    %288 = arith.mulf %283, %287 : vector<8x32xf32>
    %c0_92 = arith.constant 0 : index
    %c192 = arith.constant 192 : index
    %289 = vector.load %arg16[%c0_92, %c192] : memref<8x256xf32, #tpu.memory_space<vmem>>, vector<8x32xf32>
    tpu.vector_store %arg16[%c0_92, %c192], %288 {strides = array<i32>} : memref<8x256xf32, #tpu.memory_space<vmem>>, vector<8x32xf32>,
    %c56_93 = arith.constant 56 : index
    %c0_94 = arith.constant 0 : index
    %290 = vector.load %arg14[%c56_93, %c0_94] : memref<64x128xf32, #tpu.memory_space<vmem>>, vector<8x128xf32>
    %cst_95 = arith.constant dense<0.000000e+00> : vector<8x128xf32>
    %291 = tpu.matmul %288, %162, %cst_95 {dimension_numbers = #tpu.dot_dimension_numbers<[1], [0], [0], [1], [0, 0, 1, 1], [], []>} : vector<8x32xf32>, vector<32x128xf32>, vector<8x128xf32> -> vector<8x128xf32>
    %292 = arith.addf %290, %291 : vector<8x128xf32>
    %293 = arith.mulf %292, %8 : vector<8x128xf32>
    %294 = math.tanh %293 : vector<8x128xf32>
    %295 = arith.mulf %294, %11 : vector<8x128xf32>
    %296 = arith.addf %295, %14 : vector<8x128xf32>
    %297 = vector.extract_strided_slice %296 {offsets = [0, 0], sizes = [8, 32], strides = [1, 1]} : vector<8x128xf32> to vector<8x32xf32>
    %298 = vector.extract_strided_slice %296 {offsets = [0, 32], sizes = [8, 32], strides = [1, 1]} : vector<8x128xf32> to vector<8x32xf32>
    %299 = vector.extract_strided_slice %296 {offsets = [0, 64], sizes = [8, 32], strides = [1, 1]} : vector<8x128xf32> to vector<8x32xf32>
    %300 = vector.extract_strided_slice %296 {offsets = [0, 96], sizes = [8, 32], strides = [1, 1]} : vector<8x128xf32> to vector<8x32xf32>
    %301 = arith.mulf %298, %286 : vector<8x32xf32>
    %302 = arith.mulf %297, %299 : vector<8x32xf32>
    %303 = arith.addf %301, %302 : vector<8x32xf32>
    %304 = math.tanh %303 : vector<8x32xf32>
    %305 = arith.mulf %300, %304 : vector<8x32xf32>
    %c0_96 = arith.constant 0 : index
    %c224 = arith.constant 224 : index
    %306 = vector.load %arg16[%c0_96, %c224] : memref<8x256xf32, #tpu.memory_space<vmem>>, vector<8x32xf32>
    tpu.vector_store %arg16[%c0_96, %c224], %305 {strides = array<i32>} : memref<8x256xf32, #tpu.memory_space<vmem>>, vector<8x32xf32>,
    %c0_97 = arith.constant 0 : index
    %c0_98 = arith.constant 0 : index
    %307 = vector.load %arg16[%c0_97, %c0_98] : memref<8x256xf32, #tpu.memory_space<vmem>>, vector<8x256xf32>
    %c0_99 = arith.constant 0 : index
    %c0_100 = arith.constant 0 : index
    %308 = vector.load %arg8[%c0_99, %c0_100] : memref<256x64xf32, #tpu.memory_space<vmem>>, vector<256x64xf32>
    %cst_101 = arith.constant dense<0.000000e+00> : vector<8x64xf32>
    %309 = tpu.matmul %307, %308, %cst_101 {dimension_numbers = #tpu.dot_dimension_numbers<[1], [0], [0], [1], [0, 0, 1, 1], [], []>} : vector<8x256xf32>, vector<256x64xf32>, vector<8x64xf32> -> vector<8x64xf32>
    %c0_102 = arith.constant 0 : index
    %c0_103 = arith.constant 0 : index
    %310 = vector.load %arg1[%c0_102, %c0_103] : memref<8x4xf32, #tpu.memory_space<vmem>>, vector<8x4xf32>
    %c0_104 = arith.constant 0 : index
    %c0_105 = arith.constant 0 : index
    %311 = vector.load %arg9[%c0_104, %c0_105] : memref<4x64xf32, #tpu.memory_space<vmem>>, vector<4x64xf32>
    %cst_106 = arith.constant dense<0.000000e+00> : vector<8x64xf32>
    %312 = tpu.matmul %310, %311, %cst_106 {dimension_numbers = #tpu.dot_dimension_numbers<[1], [0], [0], [1], [0, 0, 1, 1], [], []>} : vector<8x4xf32>, vector<4x64xf32>, vector<8x64xf32> -> vector<8x64xf32>
    %313 = arith.addf %309, %312 : vector<8x64xf32>
    %c0_107 = arith.constant 0 : index
    %c0_108 = arith.constant 0 : index
    %314 = vector.load %arg10[%c0_107, %c0_108] : memref<1x64xf32, #tpu.memory_space<vmem>>, vector<1x64xf32>
    %315 = vector.broadcast %314 : vector<1x64xf32> to vector<8x64xf32>
    %316 = arith.addf %313, %315 : vector<8x64xf32>
    %cst_109 = arith.constant 0.000000e+00 : f32
    %317 = vector.broadcast %cst_109 : f32 to vector<8x64xf32>
    %318 = arith.maximumf %316, %317 : vector<8x64xf32>
    %c0_110 = arith.constant 0 : index
    %c0_111 = arith.constant 0 : index
    %319 = vector.load %arg11[%c0_110, %c0_111] : memref<64x3xf32, #tpu.memory_space<vmem>>, vector<64x3xf32>
    %cst_112 = arith.constant dense<0.000000e+00> : vector<8x3xf32>
    %320 = tpu.matmul %318, %319, %cst_112 {dimension_numbers = #tpu.dot_dimension_numbers<[1], [0], [0], [1], [0, 0, 1, 1], [], []>} : vector<8x64xf32>, vector<64x3xf32>, vector<8x3xf32> -> vector<8x3xf32>
    %c0_113 = arith.constant 0 : index
    %c0_114 = arith.constant 0 : index
    %321 = vector.load %arg12[%c0_113, %c0_114] : memref<1x3xf32, #tpu.memory_space<vmem>>, vector<1x3xf32>
    %322 = vector.broadcast %321 : vector<1x3xf32> to vector<8x3xf32>
    %323 = arith.addf %320, %322 : vector<8x3xf32>
    %c0_115 = arith.constant 0 : index
    %c0_116 = arith.constant 0 : index
    %324 = vector.load %arg13[%c0_115, %c0_116] : memref<8x3xf32, #tpu.memory_space<vmem>>, vector<8x3xf32>
    tpu.vector_store %arg13[%c0_115, %c0_116], %323 {strides = array<i32>} : memref<8x3xf32, #tpu.memory_space<vmem>>, vector<8x3xf32>,
    return
  }
}

</mosaic_0001>

<bundles_post_ra>
// kernel: tpu_custom_call.1
= control target key start
LH: loop header
LB: loop body
LE: loop exit
PB: predicated region body
PF: predicated region fallthrough
CT: control target
= control target key end

     0   :  { %vm96_vm0 = vcmask 1043456   ;;  %vm71_vm1 = vcmask 31744   ;;  %v2905_v8 = vmov 0.0|0.0   ;;  %vm2906_vm2 = vmmov 0   ;;  %s2910_s30 = smov 32   ;;  %s3553_s2 = inlined_call_operand.vmem [shape: f32[4,128], index: 2, kind: input, shape index: {}]   ;;  %s3554_s0 = inlined_call_operand.vmem [shape: f32[64,4], index: 0, kind: input, shape index: {}]   ;;  %s3555_s3 = inlined_call_operand.vmem [shape: f32[32,128], index: 3, kind: input, shape index: {}]   ;;  %s3556_s4 = inlined_call_operand.vmem [shape: f32[1,128], index: 4, kind: input, shape index: {}]   ;;  %s3557_s5 = inlined_call_operand.vmem [shape: f32[32,128], index: 5, kind: input, shape index: {}]   ;;  %s3558_s6 = inlined_call_operand.vmem [shape: f32[32,128], index: 6, kind: input, shape index: {}]   ;;  %s3559_s7 = inlined_call_operand.vmem [shape: f32[1,128], index: 7, kind: input, shape index: {}]   ;;  %s3560_s9 = inlined_call_operand.vmem [shape: f32[4,64], index: 9, kind: input, shape index: {}]   ;;  %s3561_s8 = inlined_call_operand.vmem [shape: f32[256,64], index: 8, kind: input, shape index: {}]   ;;  %s3562_s1 = inlined_call_operand.vmem [shape: f32[8,4], index: 1, kind: input, shape index: {}]   ;;  %s3563_s11 = inlined_call_operand.vmem [shape: f32[64,3], index: 11, kind: input, shape index: {}]   ;;  %s3564_s10 = inlined_call_operand.vmem [shape: f32[1,64], index: 10, kind: input, shape index: {}]   ;;  %s3565_s12 = inlined_call_operand.vmem [shape: f32[1,3], index: 12, kind: input, shape index: {}]   ;;  %s3566_s13 = inlined_call_operand.vmem [shape: f32[8,3], index: 13, kind: output, shape index: {}]  }
   0x1   :  { %v51_v0 = vld [vmem:[%s3553_s2] sm:$0xf]  ;;  %v62_v2 = vld [vmem:[%s3554_s0 + $0x28] sm:$0xff]  ;;  %v63_v5 = vld [vmem:[%s3554_s0 + $0x30] sm:$0xff]  ;;  %v2907_v14 = vmov 0.0   ;;  %v44_v15 = vlaneseq  ;;  %v2908_v25 = vmov 0.5  }
   0x2   :  { %v61_v1 = vld [vmem:[%s3554_s0 + $0x20] sm:$0xff]  ;;  %2832 = vmatprep.subr.msk.mxu1 %vm96_vm0, %v51_v0  ;;  %v53_v4 = vld [vmem:[%s3555_s3 + $0x8] sm:$0xff]  ;;  %2450 = vmatprep.subr.msk.mxu0 %vm96_vm0, %v51_v0  ;;  %v54_v10 = vld [vmem:[%s3555_s3 + $0x10] sm:$0xff]  ;;  %vm214_vm6 = vcmask 261120   ;;  %vm1372_vm7 = vcmask 523520   ;;  %vm1475_vm8 = vcmask 785920  }
   0x3   :  { %2458 = vmatprep.mubr.msk.f32.mxu1 %vm71_vm1, %v61_v1  ;;  %v52_v3 = vld [vmem:[%s3555_s3] sm:$0xff]  ;;  %2833 = vmatpush3.msk.msra.mxu1 %vm96_vm0, %v51_v0  ;;  %v58_v9 = vld [vmem:[%s3554_s0 + $0x8] sm:$0xff]  ;;  %v55_v11 = vld [vmem:[%s3555_s3 + $0x18] sm:$0xff]  ;;  %v45_v16 = vand.u32 127, %v44_v15  ;;  %vm1574_vm9 = vcmask 1048320   ;;  %vm2185_vm10 = vcmask 523264  }
   0x4   :  { %v3003_v6 = vpack.c.bf16 %v53_v4, %v52_v3  ;;  %v57_v7 = vld [vmem:[%s3554_s0] sm:$0xff]  ;;  %2459 = vmatmul.mubr.msk.f32.vlgmr.msra.gmra.mrb[0].mxu1 %vm71_vm1, %v62_v2  ;;  %2684 = vmatprep.subr.bf16.mxu1 %v2905_v8  ;;  %v64_v12 = vld [vmem:[%s3554_s0 + $0x38] sm:$0xff]  ;;  %v3025_v13 = vpack.c.bf16 %v55_v11, %v54_v10  ;;  %v59_v57 = vld [vmem:[%s3554_s0 + $0x10] sm:$0xff]  ;;  %vm2259_vm11 = vcmask 23552  }
   0x5   :  { %2461 = vmatprep.mubr.msk.f32.mxu1 %vm71_vm1, %v63_v5  ;;  %2451 = vmatpush3.msk.msra.mxu0 %vm96_vm0, %v51_v0  ;;  %vm46_vm3 = vcmp.ge.s32.totalorder %v45_v16, 64  ;;  %vm47_vm4 = vcmp.lt.s32.totalorder %v45_v16, 96  ;;  %v3055_v20 = vld [vmem:[%s3556_s4] ss:$0 sm:$0xff]  ;;  %s2909_s4 = smov 64   ;;  %v60_v58 = vld [vmem:[%s3554_s0 + $0x18] sm:$0xff] }
   0x6   :  { %2686 = vmatpush3.bf16.msra.mxu1 %v3003_v6  ;;  %2452 = vmatprep.mubr.msk.f32.mxu0 %vm71_vm1, %v57_v7  ;;  %vm48_vm5 = vmand %vm46_vm3, %vm47_vm4 }
   0x7   :  { %2687 = vmatprep.subr.bf16.mxu1 %v2905_v8  ;;  %2453 = vmatmul.mubr.msk.f32.vlgmr.msra.gmra.mrb[0].mxu0 %vm71_vm1, %v58_v9  ;;  %v3062_v26 = vsel %vm48_vm5, 1.0, %v2908_v25  ;;  %v3065_v32 = vsel %vm48_vm5, 0.0, %v2908_v25 }
   0x8   :  { %2462 = vmatmul.mubr.msk.f32.gmra.mrb[2].mxu1 %vm71_vm1, %v64_v12  ;;  %2696 = vmatprep.subr.bf16.mxu0 %v2905_v8 }
   0x9   :  { %2472 = vmatprep.mubr.msk.f32.mxu1 %vm2906_vm2, %v2907_v14  ;;  %2698 = vmatpush3.bf16.msra.mxu0 %v3003_v6 }
   0xa   :  { %2689 = vmatpush3.bf16.msra.mxu1 %v3025_v13  ;;  %2699 = vmatprep.subr.bf16.mxu0 %v2905_v8 }
   0xb   :  { %2690 = vmatprep.subr.bf16.mxu1 %v2905_v8  ;;  %2455 = vmatprep.mubr.msk.f32.mxu0 %vm71_vm1, %v59_v57 }
   0xc   :  { %2456 = vmatmul.mubr.msk.f32.gmra.mrb[2].mxu0 %vm71_vm1, %v60_v58 }
   0xd   :  { %2473 = vmatmul.mubr.f32.vlgmr.msra.gmra.mrb[4].mxu1 %v2907_v14  ;;  %2701 = vmatpush3.bf16.msra.mxu0 %v3025_v13 }
   0xe   :  { %2692 = vmatpush3.bf16.msra.mxu1 %v3003_v6  ;;  %2483 = vmatprep.mubr.msk.f32.mxu1 %vm2906_vm2, %v2907_v14 }
   0xf   :  { %2693 = vmatprep.subr.bf16.mxu1 %v2905_v8  ;;  %2708 = vmatprep.subr.bf16.mxu0 %v2905_v8 }
  0x10   :  { %2494 = vmatprep.mubr.msk.f32.mxu0 %vm2906_vm2, %v2907_v14 }
  0x12   :  { %2695 = vmatpush3.bf16.msra.mxu1 %v3025_v13 }
  0x13   :  { %2702 = vmatprep.subr.bf16.mxu1 %v2905_v8 }
  0xd7   :  { %v3048_v17 = vpop.f32.mrb[0].mxu1 }
  0xd8   :  { %v3050_v18 = vpop.f32.mrb[1].mxu1 }
  0xda   :  { %v2454_v19 = vpop.f32.mrb[0].mxu0 }
  0xdb   :  { %v3057_v21 = vpop.f32.mrb[2].mxu1  ;;  %v166_v22 = vpop.f32.mrb[1].mxu0  ;;  %v172_v44 = vadd.f32 %v2454_v19, %v3055_v20 }
  0xdc   :  { %v3059_v23 = vpop.f32.mrb[3].mxu1  ;;  %v167_v24 = vadd.f32 %v3055_v20, %v166_v22 }
  0xdf   :  { %v2457_v62 = vpop.f32.mrb[2].mxu0 }
  0xe0   :  { %v284_v27 = vpop.f32.mrb[4].mxu1  ;;  %v176_v63 = vpop.f32.mrb[3].mxu0 }
  0xe1   :  { %v288_v28 = vadd.f32 %v284_v27, %v167_v24  ;;  %v2474_v29 = vpop.f32.mrb[5].mxu1  ;;  %v177_v1 = vadd.f32 %v3055_v20, %v176_v63 }
  0xe3   :  { %v289_v30 = vmul.f32 %v288_v28, %v3062_v26  ;;  %v182_v28 = vadd.f32 %v2457_v62, %v3055_v20  ;;  %v192_v62 = vadd.f32 %v3048_v17, %v3055_v20 }
  0xe5   :  { %2841 = vtanh.f32 %v289_v30 }
  0xef   :  { %v2842_v31 = vpop.eup %2841 }
  0xf0   :  { %v291_v33 = vmul.f32 %v2842_v31, %v3062_v26 }
  0xf2   :  { %v292_v34 = vadd.f32 %v291_v33, %v3065_v32 }
  0xf4   :  { %295 = vrot.lane.b32.xlu0 %v292_v34, %s2909_s4  ;;  %v293_v37 = vmul.f32 0.0, %v292_v34 }
 0x166   :  { %v296_v35 = vpop.permute.xlu0 %295 }
 0x167   :  { %v298_v36 = vmul.f32 %v296_v35, %v292_v34 }
 0x169   :  { %300 = vrot.lane.b32.xlu0 %v298_v36, %s2910_s30 }
 0x1db   :  { %v301_v38 = vpop.permute.xlu0 %300 }
 0x1dc   :  { %v303_v39 = vadd.f32 %v301_v38, %v293_v37 }
 0x1de   :  { %2843 = vtanh.f32 %v303_v39 }
 0x1e8   :  { %v2844_v40 = vpop.eup %2843 }
 0x1e9   :  { %306 = vrot.lane.b32.xlu1 %v2844_v40, %s2909_s4 }
 0x25b   :  { %v307_v41 = vpop.permute.xlu1 %306 }
 0x25c   :  { %v309_v42 = vmul.f32 %v307_v41, %v292_v34 }
 0x25e   :  { %311 = vrot.lane.b32.xlu1 %v309_v42, %s2910_s30 }
 0x2d0   :  { %v312_v43 = vpop.permute.xlu1 %311 }
 0x2d1   :  { %314 = vst.msk [vmem:[#allocation3] sm:$0xff] %vm214_vm6, %v312_v43  ;;  %2484 = vmatmul.mubr.msk.f32.vlgmr.msra.gmra.mrb[6].mxu1 %vm214_vm6, %v312_v43 }
 0x2d2   :  { %2704 = vmatpush3.bf16.msra.mxu1 %v3003_v6  ;;  %2505 = vmatprep.mubr.msk.f32.mxu1 %vm2906_vm2, %v2907_v14 }
 0x2d3   :  { %2705 = vmatprep.subr.bf16.mxu1 %v2905_v8 }
 0x2d6   :  { %2707 = vmatpush3.bf16.msra.mxu1 %v3025_v13 }
 0x2d7   :  { %2714 = vmatprep.subr.bf16.mxu1 %v2905_v8 }
 0x3a4   :  { %v384_v45 = vpop.f32.mrb[6].mxu1 }
 0x3a5   :  { %v388_v46 = vadd.f32 %v384_v45, %v172_v44  ;;  %v2485_v47 = vpop.f32.mrb[7].mxu1 }
 0x3a7   :  { %v389_v48 = vmul.f32 %v388_v46, %v3062_v26  ;;  %v187_v46 = vadd.f32 %v3055_v20, %v3050_v18 }
 0x3a9   :  { %2845 = vtanh.f32 %v389_v48 }
 0x3b3   :  { %v2846_v49 = vpop.eup %2845 }
 0x3b4   :  { %v391_v50 = vmul.f32 %v2846_v49, %v3062_v26 }
 0x3b6   :  { %v392_v51 = vadd.f32 %v391_v50, %v3065_v32 }
 0x3b8   :  { %395 = vrot.lane.b32.xlu0 %v392_v51, %s2909_s4  ;;  %v393_v54 = vmul.f32 %v392_v51, %v303_v39 }
 0x42a   :  { %v396_v52 = vpop.permute.xlu0 %395 }
 0x42b   :  { %v398_v53 = vmul.f32 %v396_v52, %v392_v51 }
 0x42d   :  { %400 = vrot.lane.b32.xlu1 %v398_v53, %s2910_s30 }
 0x49f   :  { %v401_v55 = vpop.permute.xlu1 %400 }
 0x4a0   :  { %v403_v56 = vadd.f32 %v401_v55, %v393_v54 }
 0x4a2   :  { %2847 = vtanh.f32 %v403_v56 }
 0x4ac   :  { %v2848_v59 = vpop.eup %2847 }
 0x4ad   :  { %406 = vrot.lane.b32.xlu0 %v2848_v59, %s2909_s4 }
 0x51f   :  { %v407_v60 = vpop.permute.xlu0 %406 }
 0x520   :  { %v409_v61 = vmul.f32 %v407_v60, %v392_v51 }
 0x522   :  { %411 = vrot.lane.b32.xlu1 %v409_v61, %s2910_s30 }
 0x594   :  { %v412_v0 = vpop.permute.xlu1 %411 }
 0x595   :  { %414 = vst.msk [vmem:[#allocation3 + $0x8] sm:$0xff] %vm214_vm6, %v412_v0  ;;  %2495 = vmatmul.mubr.msk.f32.vlgmr.msra.gmra.mrb[4].mxu0 %vm214_vm6, %v412_v0 }
 0x596   :  { %2710 = vmatpush3.bf16.msra.mxu0 %v3003_v6  ;;  %2516 = vmatprep.mubr.msk.f32.mxu0 %vm2906_vm2, %v2907_v14 }
 0x597   :  { %2711 = vmatprep.subr.bf16.mxu0 %v2905_v8 }
 0x59a   :  { %2713 = vmatpush3.bf16.msra.mxu0 %v3025_v13 }
 0x59b   :  { %2720 = vmatprep.subr.bf16.mxu0 %v2905_v8 }
 0x668   :  { %v484_v2 = vpop.f32.mrb[4].mxu0 }
 0x669   :  { %v488_v3 = vadd.f32 %v484_v2, %v177_v1  ;;  %v2496_v4 = vpop.f32.mrb[5].mxu0 }
 0x66b   :  { %v489_v5 = vmul.f32 %v488_v3, %v3062_v26 }
 0x66d   :  { %2849 = vtanh.f32 %v489_v5 }
 0x677   :  { %v2850_v7 = vpop.eup %2849 }
 0x678   :  { %v491_v9 = vmul.f32 %v2850_v7, %v3062_v26 }
 0x67a   :  { %v492_v10 = vadd.f32 %v491_v9, %v3065_v32 }
 0x67c   :  { %495 = vrot.lane.b32.xlu0 %v492_v10, %s2909_s4  ;;  %v493_v15 = vmul.f32 %v492_v10, %v403_v56 }
 0x6ee   :  { %v496_v11 = vpop.permute.xlu0 %495 }
 0x6ef   :  { %v498_v12 = vmul.f32 %v496_v11, %v492_v10  ;;  %v1016_v11 = vld [vmem:[%s3557_s5 + $0x8] sm:$0xff] }
 0x6f1   :  { %500 = vrot.lane.b32.xlu1 %v498_v12, %s2910_s30 }
 0x763   :  { %v501_v16 = vpop.permute.xlu1 %500 }
 0x764   :  { %v503_v19 = vadd.f32 %v501_v16, %v493_v15 }
 0x766   :  { %2851 = vtanh.f32 %v503_v19 }
 0x770   :  { %v2852_v22 = vpop.eup %2851 }
 0x771   :  { %506 = vrot.lane.b32.xlu0 %v2852_v22, %s2909_s4  ;;  %v1017_v22 = vld [vmem:[%s3557_s5 + $0x10] sm:$0xff] }
 0x7e3   :  { %v507_v24 = vpop.permute.xlu0 %506 }
 0x7e4   :  { %v509_v25 = vmul.f32 %v507_v24, %v492_v10  ;;  %v1015_v10 = vld [vmem:[%s3557_s5] sm:$0xff]  ;;  %v1018_v24 = vld [vmem:[%s3557_s5 + $0x18] sm:$0xff] }
 0x7e5   :  { %v2732_v12 = vpack.c.bf16 %v1016_v11, %v1015_v10 }
 0x7e6   :  { %511 = vrot.lane.b32.xlu1 %v509_v25, %s2910_s30  ;;  %v2736_v25 = vpack.c.bf16 %v1018_v24, %v1017_v22 }
 0x858   :  { %v512_v27 = vpop.permute.xlu1 %511 }
 0x859   :  { %514 = vst.msk [vmem:[#allocation3 + $0x10] sm:$0xff] %vm214_vm6, %v512_v27  ;;  %2506 = vmatmul.mubr.msk.f32.vlgmr.msra.gmra.mrb[8].mxu1 %vm214_vm6, %v512_v27 }
 0x85a   :  { %2716 = vmatpush3.bf16.msra.mxu1 %v3003_v6  ;;  %2527 = vmatprep.mubr.msk.f32.mxu1 %vm2906_vm2, %v2907_v14 }
 0x85b   :  { %2717 = vmatprep.subr.bf16.mxu1 %v2905_v8 }
 0x85e   :  { %2719 = vmatpush3.bf16.msra.mxu1 %v3025_v13 }
 0x85f   :  { %2726 = vmatprep.subr.bf16.mxu1 %v2905_v8 }
 0x92c   :  { %v584_v29 = vpop.f32.mrb[8].mxu1 }
 0x92d   :  { %v588_v30 = vadd.f32 %v584_v29, %v182_v28  ;;  %v2507_v31 = vpop.f32.mrb[9].mxu1  ;;  %v1024_v28 = vld [vmem:[#allocation3] sm:$0xff]  ;;  %v1025_v29 = vld [vmem:[#allocation3 + $0x8] sm:$0xff] }
 0x92f   :  { %v589_v33 = vmul.f32 %v588_v30, %v3062_v26  ;;  %v1026_v30 = vld [vmem:[#allocation3 + $0x10] sm:$0xff] }
 0x931   :  { %2853 = vtanh.f32 %v589_v33 }
 0x93b   :  { %v2854_v34 = vpop.eup %2853 }
 0x93c   :  { %v591_v35 = vmul.f32 %v2854_v34, %v3062_v26 }
 0x93e   :  { %v592_v36 = vadd.f32 %v591_v35, %v3065_v32  ;;  %v197_v35 = vadd.f32 %v3055_v20, %v3059_v23 }
 0x940   :  { %595 = vrot.lane.b32.xlu0 %v592_v36, %s2909_s4  ;;  %v593_v39 = vmul.f32 %v592_v36, %v503_v19 }
 0x9b2   :  { %v596_v37 = vpop.permute.xlu0 %595 }
 0x9b3   :  { %v598_v38 = vmul.f32 %v596_v37, %v592_v36 }
 0x9b5   :  { %600 = vrot.lane.b32.xlu1 %v598_v38, %s2910_s30 }
 0xa27   :  { %v601_v40 = vpop.permute.xlu1 %600 }
 0xa28   :  { %v603_v41 = vadd.f32 %v601_v40, %v593_v39 }
 0xa2a   :  { %2855 = vtanh.f32 %v603_v41 }
 0xa34   :  { %v2856_v42 = vpop.eup %2855 }
 0xa35   :  { %606 = vrot.lane.b32.xlu0 %v2856_v42, %s2909_s4 }
 0xaa7   :  { %v607_v43 = vpop.permute.xlu0 %606 }
 0xaa8   :  { %v609_v44 = vmul.f32 %v607_v43, %v592_v36 }
 0xaaa   :  { %611 = vrot.lane.b32.xlu1 %v609_v44, %s2910_s30 }
 0xb1c   :  { %v612_v45 = vpop.permute.xlu1 %611 }
 0xb1d   :  { %614 = vst.msk [vmem:[#allocation3 + $0x18] sm:$0xff] %vm214_vm6, %v612_v45  ;;  %2517 = vmatmul.mubr.msk.f32.vlgmr.msra.gmra.mrb[6].mxu0 %vm214_vm6, %v612_v45 }
 0xb1e   :  { %2722 = vmatpush3.bf16.msra.mxu0 %v3003_v6  ;;  %2538 = vmatprep.mubr.msk.f32.mxu0 %vm2906_vm2, %v2907_v14 }
 0xb1f   :  { %2723 = vmatprep.subr.bf16.mxu0 %v2905_v8 }
 0xb22   :  { %2725 = vmatpush3.bf16.msra.mxu0 %v3025_v13 }
 0xb23   :  { %2733 = vmatprep.subr.bf16.mxu0 %v2732_v12 }
 0xb24   :  { %v1027_v31 = vld [vmem:[#allocation3 + $0x18] sm:$0xff] }
 0xbf0   :  { %v684_v47 = vpop.f32.mrb[6].mxu0 }
 0xbf1   :  { %v688_v48 = vadd.f32 %v684_v47, %v187_v46  ;;  %v2518_v49 = vpop.f32.mrb[7].mxu0 }
 0xbf3   :  { %v689_v50 = vmul.f32 %v688_v48, %v3062_v26 }
 0xbf5   :  { %2857 = vtanh.f32 %v689_v50 }
 0xbff   :  { %v2858_v51 = vpop.eup %2857 }
 0xc00   :  { %v691_v52 = vmul.f32 %v2858_v51, %v3062_v26 }
 0xc02   :  { %v692_v53 = vadd.f32 %v691_v52, %v3065_v32 }
 0xc04   :  { %695 = vrot.lane.b32.xlu0 %v692_v53, %s2909_s4  ;;  %v693_v56 = vmul.f32 %v692_v53, %v603_v41 }
 0xc76   :  { %v696_v54 = vpop.permute.xlu0 %695 }
 0xc77   :  { %v698_v55 = vmul.f32 %v696_v54, %v692_v53  ;;  %v1019_v54 = vld [vmem:[%s3558_s6] sm:$0xff] }
 0xc79   :  { %700 = vrot.lane.b32.xlu1 %v698_v55, %s2910_s30  ;;  %v1020_v55 = vld [vmem:[%s3558_s6 + $0x8] sm:$0xff] }
 0xceb   :  { %v701_v57 = vpop.permute.xlu1 %700 }
 0xcec   :  { %v703_v18 = vadd.f32 %v701_v57, %v693_v56  ;;  %v3212_v56 = vpack.c.bf16 %v1020_v55, %v1019_v54  ;;  %v1021_v57 = vld [vmem:[%s3558_s6 + $0x10] sm:$0xff] }
 0xcee   :  { %2859 = vtanh.f32 %v703_v18 }
 0xcf8   :  { %v2860_v58 = vpop.eup %2859 }
 0xcf9   :  { %706 = vrot.lane.b32.xlu0 %v2860_v58, %s2909_s4 }
 0xd6b   :  { %v707_v59 = vpop.permute.xlu0 %706 }
 0xd6c   :  { %v709_v60 = vmul.f32 %v707_v59, %v692_v53 }
 0xd6e   :  { %711 = vrot.lane.b32.xlu1 %v709_v60, %s2910_s30 }
 0xde0   :  { %v712_v61 = vpop.permute.xlu1 %711 }
 0xde1   :  { %714 = vst.msk [vmem:[#allocation3 + $0x20] sm:$0xff] %vm214_vm6, %v712_v61  ;;  %2528 = vmatmul.mubr.msk.f32.vlgmr.msra.gmra.mrb[10].mxu1 %vm214_vm6, %v712_v61 }
 0xde2   :  { %2728 = vmatpush3.bf16.msra.mxu1 %v3003_v6  ;;  %2549 = vmatprep.mubr.msk.f32.mxu1 %vm2906_vm2, %v2907_v14 }
 0xde3   :  { %2729 = vmatprep.subr.bf16.mxu1 %v2905_v8 }
 0xde6   :  { %2731 = vmatpush3.bf16.msra.mxu1 %v3025_v13 }
 0xde7   :  { %2740 = vmatprep.subr.bf16.mxu1 %v2905_v8 }
 0xde8   :  { %v1028_v33 = vld [vmem:[#allocation3 + $0x20] sm:$0xff] }
 0xeb4   :  { %v784_v63 = vpop.f32.mrb[10].mxu1 }
 0xeb5   :  { %v788_v0 = vadd.f32 %v784_v63, %v192_v62  ;;  %v2529_v1 = vpop.f32.mrb[11].mxu1  ;;  %v202_v63 = vadd.f32 %v3057_v21, %v3055_v20 }
 0xeb7   :  { %v789_v2 = vmul.f32 %v788_v0, %v3062_v26 }
 0xeb9   :  { %2861 = vtanh.f32 %v789_v2 }
 0xec3   :  { %v2862_v3 = vpop.eup %2861 }
 0xec4   :  { %v791_v6 = vmul.f32 %v2862_v3, %v3062_v26  ;;  %v3248_v3 = vld [vmem:[%s3559_s7] ss:$0 sm:$0xff]  ;;  %s2911_s7 = smov 96  }
 0xec6   :  { %v792_v4 = vadd.f32 %v791_v6, %v3065_v32 }
 0xec8   :  { %795 = vrot.lane.b32.xlu0 %v792_v4, %s2909_s4  ;;  %v793_v7 = vmul.f32 %v792_v4, %v703_v18  ;;  %v1022_v18 = vld [vmem:[%s3558_s6 + $0x18] sm:$0xff] }
 0xec9   :  { %v3222_v58 = vpack.c.bf16 %v1022_v18, %v1021_v57 }
 0xf3a   :  { %v796_v5 = vpop.permute.xlu0 %795 }
 0xf3b   :  { %v798_v13 = vmul.f32 %v796_v5, %v792_v4 }
 0xf3d   :  { %800 = vrot.lane.b32.xlu1 %v798_v13, %s2910_s30 }
 0xfaf   :  { %v801_v9 = vpop.permute.xlu1 %800 }
 0xfb0   :  { %v803_v17 = vadd.f32 %v801_v9, %v793_v7 }
 0xfb2   :  { %2863 = vtanh.f32 %v803_v17 }
 0xfbc   :  { %v2864_v15 = vpop.eup %2863 }
 0xfbd   :  { %806 = vrot.lane.b32.xlu0 %v2864_v15, %s2909_s4 }
0x102f   :  { %v807_v16 = vpop.permute.xlu0 %806 }
0x1030   :  { %v809_v19 = vmul.f32 %v807_v16, %v792_v4 }
0x1032   :  { %811 = vrot.lane.b32.xlu1 %v809_v19, %s2910_s30 }
0x10a4   :  { %v812_v27 = vpop.permute.xlu1 %811 }
0x10a5   :  { %814 = vst.msk [vmem:[#allocation3 + $0x28] sm:$0xff] %vm214_vm6, %v812_v27  ;;  %2539 = vmatmul.mubr.msk.f32.vlgmr.msra.gmra.mrb[8].mxu0 %vm214_vm6, %v812_v27 }
0x10a6   :  { %2735 = vmatpush3.bf16.msra.mxu0 %v2732_v12  ;;  %2560 = vmatprep.mubr.msk.f32.mxu0 %vm214_vm6, %v1024_v28 }
0x10a7   :  { %2737 = vmatprep.subr.bf16.mxu0 %v2736_v25 }
0x10aa   :  { %2739 = vmatpush3.bf16.msra.mxu0 %v2736_v25 }
0x10ab   :  { %2752 = vmatprep.subr.bf16.mxu0 %v2905_v8 }
0x10ac   :  { %v1029_v34 = vld [vmem:[#allocation3 + $0x28] sm:$0xff] }
0x10ad   :  { %2561 = vmatmul.mubr.msk.f32.vlgmr.msra.gmra.mrb[10].mxu0 %vm214_vm6, %v1025_v29 }
0x10ae   :  { %2563 = vmatprep.mubr.msk.f32.mxu0 %vm214_vm6, %v1026_v30  ;;  %2754 = vmatpush3.bf16.msra.mxu0 %v3212_v56 }
0x10af   :  { %2755 = vmatprep.subr.bf16.mxu0 %v2905_v8 }
0x10b1   :  { %2564 = vmatmul.mubr.msk.f32.gmra.mrb[12].mxu0 %vm214_vm6, %v1027_v31 }
0x10b2   :  { %2566 = vmatprep.mubr.msk.f32.mxu0 %vm214_vm6, %v1028_v33  ;;  %2757 = vmatpush3.bf16.msra.mxu0 %v3222_v58 }
0x10b3   :  { %2764 = vmatprep.subr.bf16.mxu0 %v2905_v8 }
0x10b5   :  { %2567 = vmatmul.mubr.msk.f32.gmra.mrb[14].mxu0 %vm214_vm6, %v1029_v34 }
0x1178   :  { %v884_v36 = vpop.f32.mrb[8].mxu0 }
0x1179   :  { %v888_v37 = vadd.f32 %v884_v36, %v197_v35  ;;  %v2540_v38 = vpop.f32.mrb[9].mxu0 }
0x117b   :  { %v889_v39 = vmul.f32 %v888_v37, %v3062_v26 }
0x117d   :  { %2865 = vtanh.f32 %v889_v39 }
0x1180   :  { %v3188_v40 = vpop.f32.mrb[10].mxu0 }
0x1181   :  { %v1128_v41 = vpop.f32.mrb[11].mxu0  ;;  %v1134_v39 = vadd.f32 %v3188_v40, %v3248_v3 }
0x1182   :  { %v1129_v6 = vadd.f32 %v3248_v3, %v1128_v41 }
0x1184   :  { %v3190_v42 = vpop.f32.mrb[12].mxu0 }
0x1185   :  { %v3192_v43 = vpop.f32.mrb[13].mxu0 }
0x1187   :  { %v2866_v44 = vpop.eup %2865 }
0x1188   :  { %v3194_v45 = vpop.f32.mrb[14].mxu0  ;;  %v891_v46 = vmul.f32 %v2866_v44, %v3062_v26 }
0x1189   :  { %v3197_v47 = vpop.f32.mrb[15].mxu0 }
0x118a   :  { %v892_v23 = vadd.f32 %v891_v46, %v3065_v32 }
0x118c   :  { %895 = vrot.lane.b32.xlu0 %v892_v23, %s2909_s4  ;;  %v893_v50 = vmul.f32 %v892_v23, %v803_v17 }
0x11fe   :  { %v896_v48 = vpop.permute.xlu0 %895 }
0x11ff   :  { %v898_v49 = vmul.f32 %v896_v48, %v892_v23 }
0x1201   :  { %900 = vrot.lane.b32.xlu1 %v898_v49, %s2910_s30 }
0x1273   :  { %v901_v51 = vpop.permute.xlu1 %900 }
0x1274   :  { %v3202_v52 = vadd.f32 %v901_v51, %v893_v50 }
0x1276   :  { %2867 = vtanh.f32 %v3202_v52 }
0x1280   :  { %v2868_v53 = vpop.eup %2867 }
0x1281   :  { %906 = vrot.lane.b32.xlu0 %v2868_v53, %s2909_s4 }
0x12f3   :  { %v907_v59 = vpop.permute.xlu0 %906 }
0x12f4   :  { %v909_v60 = vmul.f32 %v907_v59, %v892_v23 }
0x12f6   :  { %911 = vrot.lane.b32.xlu1 %v909_v60, %s2910_s30 }
0x1368   :  { %v912_v61 = vpop.permute.xlu1 %911 }
0x1369   :  { %914 = vst.msk [vmem:[#allocation3 + $0x30] sm:$0xff] %vm214_vm6, %v912_v61  ;;  %2550 = vmatmul.mubr.msk.f32.vlgmr.msra.gmra.mrb[12].mxu1 %vm214_vm6, %v912_v61 }
0x136a   :  { %2742 = vmatpush3.bf16.msra.mxu1 %v3212_v56  ;;  %2580 = vmatprep.mubr.msk.f32.mxu1 %vm2906_vm2, %v2907_v14 }
0x136b   :  { %2743 = vmatprep.subr.bf16.mxu1 %v2905_v8 }
0x136e   :  { %2745 = vmatpush3.bf16.msra.mxu1 %v3222_v58 }
0x136f   :  { %2746 = vmatprep.subr.bf16.mxu1 %v2905_v8 }
0x1370   :  { %v1030_v62 = vld [vmem:[#allocation3 + $0x30] sm:$0xff] }
0x1371   :  { %2581 = vmatmul.mubr.f32.vlgmr.msra.gmra.mrb[14].mxu1 %v2907_v14  ;;  %2569 = vmatprep.mubr.msk.f32.mxu0 %vm214_vm6, %v1030_v62 }
0x1372   :  { %2748 = vmatpush3.bf16.msra.mxu1 %v3212_v56  ;;  %2591 = vmatprep.mubr.msk.f32.mxu1 %vm2906_vm2, %v2907_v14 }
0x1373   :  { %2749 = vmatprep.subr.bf16.mxu1 %v2905_v8 }
0x1376   :  { %2751 = vmatpush3.bf16.msra.mxu1 %v3222_v58 }
0x1377   :  { %2758 = vmatprep.subr.bf16.mxu1 %v2905_v8 }
0x143c   :  { %v984_v0 = vpop.f32.mrb[12].mxu1 }
0x143d   :  { %v988_v1 = vadd.f32 %v984_v0, %v202_v63  ;;  %v2551_v2 = vpop.f32.mrb[13].mxu1  ;;  %v1139_v0 = vadd.f32 %v3248_v3, %v3192_v43 }
0x143f   :  { %v989_v11 = vmul.f32 %v988_v1, %v3062_v26 }
0x1444   :  { %v1242_v4 = vpop.f32.mrb[14].mxu1 }
0x1445   :  { %v1246_v5 = vadd.f32 %v1242_v4, %v1129_v6  ;;  %v2582_v13 = vpop.f32.mrb[15].mxu1 }
0x1447   :  { %v1247_v7 = vmul.f32 %v1246_v5, %v3062_v26 }
0x1449   :  { %2869 = vtanh.f32 %v1247_v7 }
0x144a   :  { %2871 = vtanh.f32 %v989_v11 }
0x1453   :  { %v2870_v9 = vpop.eup %2869 }
0x1454   :  { %v1249_v17 = vmul.f32 %v2870_v9, %v3062_v26  ;;  %v2872_v19 = vpop.eup %2871 }
0x1455   :  { %v991_v22 = vmul.f32 %v2872_v19, %v3062_v26 }
0x1456   :  { %v1250_v20 = vadd.f32 %v1249_v17, %v3065_v32 }
0x1457   :  { %v992_v25 = vadd.f32 %v991_v22, %v3065_v32 }
0x1458   :  { %1253 = vrot.lane.b32.xlu0 %v1250_v20, %s2909_s4  ;;  %v1251_v12 = vmul.f32 0.0, %v1250_v20 }
0x1459   :  { %v993_v33 = vmul.f32 %v992_v25, %v3202_v52 }
0x14ca   :  { %v1254_v21 = vpop.permute.xlu0 %1253 }
0x14cb   :  { %v1256_v10 = vmul.f32 %v1254_v21, %v1250_v20 }
0x14cd   :  { %1258 = vrot.lane.b32.xlu1 %v1256_v10, %s2910_s30 }
0x153f   :  { %v1259_v15 = vpop.permute.xlu1 %1258 }
0x1540   :  { %v1261_v16 = vadd.f32 %v1259_v15, %v1251_v12 }
0x1542   :  { %2873 = vtanh.f32 %v1261_v16 }
0x154c   :  { %v2874_v24 = vpop.eup %2873 }
0x154d   :  { %1264 = vrot.lane.b32.xlu0 %v2874_v24, %s2909_s4 }
0x1551   :  { %995 = vrot.lane.b32.xlu0 %v992_v25, %s2909_s4 }
0x15bf   :  { %v1265_v27 = vpop.permute.xlu0 %1264 }
0x15c0   :  { %v1267_v28 = vmul.f32 %v1265_v27, %v1250_v20 }
0x15c2   :  { %1269 = vrot.lane.b32.xlu1 %v1267_v28, %s2910_s30 }
0x15c3   :  { %v996_v29 = vpop.permute.xlu0 %995 }
0x15c4   :  { %v998_v30 = vmul.f32 %v996_v29, %v992_v25 }
0x15c6   :  { %1000 = vrot.lane.b32.xlu0 %v998_v30, %s2910_s30 }
0x1634   :  { %v1270_v31 = vpop.permute.xlu1 %1269 }
0x1635   :  { %1272 = vst.msk [vmem:[#allocation4] sm:$0xff] %vm214_vm6, %v1270_v31  ;;  %2592 = vmatmul.mubr.msk.f32.vlgmr.msra.gmra.mrb[16].mxu1 %vm214_vm6, %v1270_v31 }
0x1636   :  { %2760 = vmatpush3.bf16.msra.mxu1 %v3212_v56  ;;  %2613 = vmatprep.mubr.msk.f32.mxu1 %vm2906_vm2, %v2907_v14 }
0x1637   :  { %2761 = vmatprep.subr.bf16.mxu1 %v2905_v8 }
0x1638   :  { %v1001_v34 = vpop.permute.xlu0 %1000 }
0x1639   :  { %v1003_v35 = vadd.f32 %v1001_v34, %v993_v33 }
0x163a   :  { %2763 = vmatpush3.bf16.msra.mxu1 %v3222_v58 }
0x163b   :  { %2875 = vtanh.f32 %v1003_v35  ;;  %2770 = vmatprep.subr.bf16.mxu1 %v2905_v8 }
0x1645   :  { %v2876_v36 = vpop.eup %2875 }
0x1646   :  { %1006 = vrot.lane.b32.xlu0 %v2876_v36, %s2909_s4 }
0x16b8   :  { %v1007_v37 = vpop.permute.xlu0 %1006 }
0x16b9   :  { %v1009_v38 = vmul.f32 %v1007_v37, %v992_v25 }
0x16bb   :  { %1011 = vrot.lane.b32.xlu0 %v1009_v38, %s2910_s30 }
0x1708   :  { %v1342_v41 = vpop.f32.mrb[16].mxu1 }
0x1709   :  { %v1346_v44 = vadd.f32 %v1342_v41, %v1134_v39  ;;  %v2593_v46 = vpop.f32.mrb[17].mxu1  ;;  %v1149_v39 = vadd.f32 %v3248_v3, %v3197_v47 }
0x170b   :  { %v1347_v23 = vmul.f32 %v1346_v44, %v3062_v26 }
0x170d   :  { %2877 = vtanh.f32 %v1347_v23 }
0x1717   :  { %v2878_v48 = vpop.eup %2877 }
0x1718   :  { %v1349_v49 = vmul.f32 %v2878_v48, %v3062_v26 }
0x171a   :  { %v1350_v50 = vadd.f32 %v1349_v49, %v3065_v32 }
0x171c   :  { %1353 = vrot.lane.b32.xlu1 %v1350_v50, %s2909_s4  ;;  %v1351_v54 = vmul.f32 %v1350_v50, %v1261_v16  ;;  %v1144_v16 = vadd.f32 %v3190_v42, %v3248_v3 }
0x172d   :  { %v1012_v51 = vpop.permute.xlu0 %1011 }
0x172e   :  { %1014 = vst.msk [vmem:[#allocation3 + $0x38] sm:$0xff] %vm214_vm6, %v1012_v51 }
0x1735   :  { %v1031_v52 = vld [vmem:[#allocation3 + $0x38] sm:$0xff] }
0x1736   :  { %2570 = vmatmul.mubr.msk.f32.gmra.mrb[16].mxu0 %vm214_vm6, %v1031_v52 }
0x1737   :  { %2602 = vmatprep.mubr.msk.f32.mxu0 %vm2906_vm2, %v2907_v14 }
0x178e   :  { %v1354_v40 = vpop.permute.xlu1 %1353 }
0x178f   :  { %v1356_v53 = vmul.f32 %v1354_v40, %v1350_v50 }
0x1791   :  { %1358 = vrot.lane.b32.xlu1 %v1356_v53, %s2910_s30 }
0x1803   :  { %v1359_v55 = vpop.permute.xlu1 %1358 }
0x1804   :  { %v1361_v57 = vadd.f32 %v1359_v55, %v1351_v54 }
0x1806   :  { %2879 = vtanh.f32 %v1361_v57 }
0x1809   :  { %v3285_v18 = vpop.f32.mrb[16].mxu0 }
0x180a   :  { %v3287_v59 = vpop.f32.mrb[17].mxu0 }
0x1810   :  { %v2880_v60 = vpop.eup %2879 }
0x1811   :  { %1364 = vrot.lane.b32.xlu1 %v2880_v60, %s2909_s4 }
0x1883   :  { %v1365_v61 = vpop.permute.xlu1 %1364 }
0x1884   :  { %v3290_v62 = vmul.f32 %v1365_v61, %v1350_v50  ;;  %v1154_v61 = vadd.f32 %v3194_v45, %v3248_v3 }
0x1886   :  { %1375 = vrot.lane.b32.xlu1 %v3290_v62, %s2910_s30 }
0x18f8   :  { %v1376_v63 = vpop.permute.xlu1 %1375 }
0x18f9   :  { %2603 = vmatmul.mubr.msk.f32.vlgmr.msra.gmra.mrb[18].mxu0 %vm214_vm6, %v1376_v63 }
0x18fa   :  { %2766 = vmatpush3.bf16.msra.mxu0 %v3212_v56  ;;  %2624 = vmatprep.mubr.msk.f32.mxu0 %vm2906_vm2, %v2907_v14 }
0x18fb   :  { %2767 = vmatprep.subr.bf16.mxu0 %v2905_v8 }
0x18fe   :  { %2769 = vmatpush3.bf16.msra.mxu0 %v3222_v58 }
0x18ff   :  { %2776 = vmatprep.subr.bf16.mxu0 %v2905_v8 }
0x19cc   :  { %v1445_v1 = vpop.f32.mrb[18].mxu0 }
0x19cd   :  { %v1449_v2 = vadd.f32 %v1445_v1, %v1139_v0  ;;  %v2604_v6 = vpop.f32.mrb[19].mxu0 }
0x19cf   :  { %v1450_v4 = vmul.f32 %v1449_v2, %v3062_v26 }
0x19d1   :  { %2881 = vtanh.f32 %v1450_v4 }
0x19db   :  { %v2882_v5 = vpop.eup %2881 }
0x19dc   :  { %v1452_v13 = vmul.f32 %v2882_v5, %v3062_v26 }
0x19de   :  { %v1453_v7 = vadd.f32 %v1452_v13, %v3065_v32 }
0x19e0   :  { %1456 = vrot.lane.b32.xlu0 %v1453_v7, %s2909_s4  ;;  %v1454_v20 = vmul.f32 %v1453_v7, %v1361_v57 }
0x1a52   :  { %v1457_v9 = vpop.permute.xlu0 %1456 }
0x1a53   :  { %v1459_v17 = vmul.f32 %v1457_v9, %v1453_v7 }
0x1a55   :  { %1461 = vrot.lane.b32.xlu1 %v1459_v17, %s2910_s30 }
0x1ac7   :  { %v1462_v21 = vpop.permute.xlu1 %1461 }
0x1ac8   :  { %v1464_v43 = vadd.f32 %v1462_v21, %v1454_v20 }
0x1aca   :  { %2883 = vtanh.f32 %v1464_v43 }
0x1ad4   :  { %v2884_v10 = vpop.eup %2883 }
0x1ad5   :  { %1467 = vrot.lane.b32.xlu0 %v2884_v10, %s2909_s4 }
0x1b47   :  { %v1468_v11 = vpop.permute.xlu0 %1467 }
0x1b48   :  { %v3309_v12 = vmul.f32 %v1468_v11, %v1453_v7 }
0x1b4a   :  { %1478 = vrot.lane.b32.xlu1 %v3309_v12, %s2910_s30 }
0x1bbc   :  { %v1479_v15 = vpop.permute.xlu1 %1478 }
0x1bbd   :  { %2614 = vmatmul.mubr.msk.f32.vlgmr.msra.gmra.mrb[18].mxu1 %vm214_vm6, %v1479_v15 }
0x1bbe   :  { %2772 = vmatpush3.bf16.msra.mxu1 %v3212_v56  ;;  %2635 = vmatprep.mubr.msk.f32.mxu1 %vm2906_vm2, %v2907_v14 }
0x1bbf   :  { %2773 = vmatprep.subr.bf16.mxu1 %v2905_v8 }
0x1bc2   :  { %2775 = vmatpush3.bf16.msra.mxu1 %v3222_v58 }
0x1bc3   :  { %2782 = vmatprep.subr.bf16.mxu1 %v2905_v8 }
0x1c90   :  { %v1548_v19 = vpop.f32.mrb[18].mxu1 }
0x1c91   :  { %v1552_v22 = vadd.f32 %v1548_v19, %v1144_v16  ;;  %v2615_v24 = vpop.f32.mrb[19].mxu1 }
0x1c93   :  { %v1553_v25 = vmul.f32 %v1552_v22, %v3062_v26 }
0x1c95   :  { %2885 = vtanh.f32 %v1553_v25 }
0x1c9f   :  { %v2886_v27 = vpop.eup %2885 }
0x1ca0   :  { %v1555_v28 = vmul.f32 %v2886_v27, %v3062_v26 }
0x1ca2   :  { %v1556_v29 = vadd.f32 %v1555_v28, %v3065_v32 }
0x1ca4   :  { %1559 = vrot.lane.b32.xlu0 %v1556_v29, %s2909_s4  ;;  %v1557_v33 = vmul.f32 %v1556_v29, %v1464_v43  ;;  %v1159_v43 = vadd.f32 %v3248_v3, %v3287_v59 }
0x1d16   :  { %v1560_v30 = vpop.permute.xlu0 %1559 }
0x1d17   :  { %v1562_v31 = vmul.f32 %v1560_v30, %v1556_v29 }
0x1d19   :  { %1564 = vrot.lane.b32.xlu1 %v1562_v31, %s2910_s30 }
0x1d8b   :  { %v1565_v34 = vpop.permute.xlu1 %1564 }
0x1d8c   :  { %v1567_v42 = vadd.f32 %v1565_v34, %v1557_v33 }
0x1d8e   :  { %2887 = vtanh.f32 %v1567_v42 }
0x1d98   :  { %v2888_v35 = vpop.eup %2887 }
0x1d99   :  { %1570 = vrot.lane.b32.xlu0 %v2888_v35, %s2909_s4 }
0x1e0b   :  { %v1571_v36 = vpop.permute.xlu0 %1570 }
0x1e0c   :  { %v3328_v37 = vmul.f32 %v1571_v36, %v1556_v29 }
0x1e0e   :  { %1578 = vrot.lane.b32.xlu1 %v3328_v37, %s2910_s30 }
0x1e80   :  { %v1579_v38 = vpop.permute.xlu1 %1578 }
0x1e81   :  { %2625 = vmatmul.mubr.msk.f32.vlgmr.msra.gmra.mrb[20].mxu0 %vm214_vm6, %v1579_v38 }
0x1e82   :  { %2778 = vmatpush3.bf16.msra.mxu0 %v3212_v56  ;;  %2646 = vmatprep.mubr.msk.f32.mxu0 %vm2906_vm2, %v2907_v14 }
0x1e83   :  { %2779 = vmatprep.subr.bf16.mxu0 %v2905_v8 }
0x1e86   :  { %2781 = vmatpush3.bf16.msra.mxu0 %v3222_v58 }
0x1e87   :  { %2660 = vmatprep.subr.mxu0 %v2907_v14 }
0x1f54   :  { %v1648_v41 = vpop.f32.mrb[20].mxu0 }
0x1f55   :  { %v1652_v44 = vadd.f32 %v1648_v41, %v1149_v39  ;;  %v2626_v46 = vpop.f32.mrb[21].mxu0 }
0x1f57   :  { %v1653_v23 = vmul.f32 %v1652_v44, %v3062_v26 }
0x1f59   :  { %2889 = vtanh.f32 %v1653_v23 }
0x1f63   :  { %v2890_v48 = vpop.eup %2889 }
0x1f64   :  { %v1655_v49 = vmul.f32 %v2890_v48, %v3062_v26  ;;  %v2013_v48 = vld [vmem:[%s3562_s1] sm:$0xff] }
0x1f66   :  { %v1656_v50 = vadd.f32 %v1655_v49, %v3065_v32  ;;  %v1981_v49 = vld [vmem:[%s3561_s8] sm:$0xff] }
0x1f68   :  { %1659 = vrot.lane.b32.xlu0 %v1656_v50, %s2909_s4  ;;  %v1657_v40 = vmul.f32 %v1656_v50, %v1567_v42  ;;  %v1164_v42 = vadd.f32 %v3285_v18, %v3248_v3  ;;  %v2014_v18 = vld [vmem:[%s3560_s9] sm:$0xf] }
0x1fda   :  { %v1660_v51 = vpop.permute.xlu0 %1659 }
0x1fdb   :  { %v1662_v52 = vmul.f32 %v1660_v51, %v1656_v50 }
0x1fdd   :  { %1664 = vrot.lane.b32.xlu1 %v1662_v52, %s2910_s30  ;;  %v1999_v52 = vld [vmem:[%s3561_s8 + $0x90] sm:$0xff] }
0x204f   :  { %v1665_v53 = vpop.permute.xlu1 %1664 }
0x2050   :  { %v1667_v47 = vadd.f32 %v1665_v53, %v1657_v40  ;;  %v2000_v40 = vld [vmem:[%s3561_s8 + $0x98] sm:$0xff]  ;;  %v1983_v53 = vld [vmem:[%s3561_s8 + $0x10] sm:$0xff] }
0x2052   :  { %2891 = vtanh.f32 %v1667_v47 }
0x205c   :  { %v2892_v54 = vpop.eup %2891 }
0x205d   :  { %1670 = vrot.lane.b32.xlu0 %v2892_v54, %s2909_s4  ;;  %v1984_v54 = vld [vmem:[%s3561_s8 + $0x18] sm:$0xff] }
0x20cf   :  { %v1671_v55 = vpop.permute.xlu0 %1670 }
0x20d0   :  { %v1673_v57 = vmul.f32 %v1671_v55, %v1656_v50  ;;  %v1982_v50 = vld [vmem:[%s3561_s8 + $0x8] sm:$0xff]  ;;  %v2001_v55 = vld [vmem:[%s3561_s8 + $0xa0] sm:$0xff] }
0x20d1   :  { %v2790_v51 = vpack.c.bf16 %v1982_v50, %v1981_v49  ;;  %v2174_v50 = vld [vmem:[%s3563_s11 + $0x20] sm:$0xff] }
0x20d2   :  { %1675 = vrot.lane.b32.xlu1 %v1673_v57, %s2910_s30  ;;  %v2002_v57 = vld [vmem:[%s3561_s8 + $0xa8] sm:$0xff] }
0x2144   :  { %v1676_v60 = vpop.permute.xlu1 %1675 }
0x2145   :  { %1678 = vst.msk [vmem:[#allocation4 + $0x8] sm:$0xff] %vm214_vm6, %v1676_v60  ;;  %2636 = vmatmul.mubr.msk.f32.vlgmr.msra.gmra.mrb[20].mxu1 %vm214_vm6, %v1676_v60 }
0x2146   :  { %2784 = vmatpush3.bf16.msra.mxu1 %v3212_v56  ;;  %2657 = vmatprep.mubr.msk.f32.mxu1 %vm2906_vm2, %v2907_v14 }
0x2147   :  { %2785 = vmatprep.subr.bf16.mxu1 %v2905_v8 }
0x214a   :  { %2787 = vmatpush3.bf16.msra.mxu1 %v3222_v58 }
0x214b   :  { %2820 = vmatprep.subr.bf16.mxu1 %v2905_v8 }
0x2218   :  { %v1748_v63 = vpop.f32.mrb[20].mxu1 }
0x2219   :  { %v1752_v0 = vadd.f32 %v1748_v63, %v1154_v61  ;;  %v2637_v1 = vpop.f32.mrb[21].mxu1  ;;  %v2794_v61 = vpack.c.bf16 %v1984_v54, %v1983_v53  ;;  %v2796_v63 = vpack.c.bf16 %v2002_v57, %v2001_v55  ;;  %v2300_v57 = vld [vmem:[%s3564_s10] ss:$0 sm:$0xff] }
0x221a   :  { %v1986_v1 = vld [vmem:[%s3561_s8 + $0x28] sm:$0xff] }
0x221b   :  { %v1753_v2 = vmul.f32 %v1752_v0, %v3062_v26  ;;  %v1985_v0 = vld [vmem:[%s3561_s8 + $0x20] sm:$0xff] }
0x221d   :  { %2893 = vtanh.f32 %v1753_v2  ;;  %v2003_v2 = vld [vmem:[%s3561_s8 + $0xb0] sm:$0xff] }
0x2227   :  { %v2894_v6 = vpop.eup %2893 }
0x2228   :  { %v1755_v56 = vmul.f32 %v2894_v6, %v3062_v26  ;;  %v2004_v6 = vld [vmem:[%s3561_s8 + $0xb8] sm:$0xff] }
0x222a   :  { %v1756_v4 = vadd.f32 %v1755_v56, %v3065_v32  ;;  %v2798_v56 = vpack.c.bf16 %v1986_v1, %v1985_v0 }
0x222c   :  { %1759 = vrot.lane.b32.xlu0 %v1756_v4, %s2909_s4  ;;  %v1757_v13 = vmul.f32 %v1756_v4, %v1667_v47  ;;  %v2792_v47 = vpack.c.bf16 %v2000_v40, %v1999_v52  ;;  %v2177_v40 = vld [vmem:[%s3563_s11 + $0x38] sm:$0xff] }
0x229e   :  { %v1760_v5 = vpop.permute.xlu0 %1759 }
0x229f   :  { %v1762_v58 = vmul.f32 %v1760_v5, %v1756_v4  ;;  %v1987_v5 = vld [vmem:[%s3561_s8 + $0x30] sm:$0xff] }
0x22a1   :  { %1764 = vrot.lane.b32.xlu1 %v1762_v58, %s2910_s30  ;;  %v2005_v58 = vld [vmem:[%s3561_s8 + $0xc0] sm:$0xff] }
0x2313   :  { %v1765_v7 = vpop.permute.xlu1 %1764 }
0x2314   :  { %v1767_v45 = vadd.f32 %v1765_v7, %v1757_v13  ;;  %v2006_v13 = vld [vmem:[%s3561_s8 + $0xc8] sm:$0xff] }
0x2316   :  { %2895 = vtanh.f32 %v1767_v45 }
0x2320   :  { %v2896_v9 = vpop.eup %2895 }
0x2321   :  { %1770 = vrot.lane.b32.xlu0 %v2896_v9, %s2909_s4  ;;  %v1989_v9 = vld [vmem:[%s3561_s8 + $0x40] sm:$0xff] }
0x2393   :  { %v1771_v17 = vpop.permute.xlu0 %1770 }
0x2394   :  { %v1773_v20 = vmul.f32 %v1771_v17, %v1756_v4  ;;  %v2800_v4 = vpack.c.bf16 %v2004_v6, %v2003_v2  ;;  %v1990_v17 = vld [vmem:[%s3561_s8 + $0x48] sm:$0xff] }
0x2396   :  { %1780 = vrot.lane.b32.xlu1 %v1773_v20, %s2910_s30 }
0x2408   :  { %v1781_v21 = vpop.permute.xlu1 %1780 }
0x2409   :  { %2647 = vmatmul.mubr.msk.f32.vlgmr.msra.gmra.mrb[22].mxu0 %vm214_vm6, %v1781_v21 }
0x240a   :  { %2662 = vmatprep.mubr.msk.f32.mxu0 %vm2906_vm2, %v2907_v14  ;;  %2661 = vmatpush3.msk.msra.mxu0 %vm96_vm0, %v2014_v18 }
0x240d   :  { %2663 = vmatmul.mubr.msk.f32.vlgmr.msra.gmra.mrb[24].mxu0 %vm71_vm1, %v2013_v48 }
0x24dc   :  { %v1850_v10 = vpop.f32.mrb[22].mxu0 }
0x24dd   :  { %v1854_v11 = vadd.f32 %v1850_v10, %v1159_v43  ;;  %v2648_v15 = vpop.f32.mrb[23].mxu0  ;;  %v2007_v10 = vld [vmem:[%s3561_s8 + $0xd0] sm:$0xff] }
0x24df   :  { %v1855_v16 = vmul.f32 %v1854_v11, %v3062_v26  ;;  %v2008_v11 = vld [vmem:[%s3561_s8 + $0xd8] sm:$0xff] }
0x24e0   :  { %v2087_v18 = vpop.f32.mrb[24].mxu0 }
0x24e1   :  { %2897 = vtanh.f32 %v1855_v16  ;;  %v2808_v16 = vpack.c.bf16 %v2008_v11, %v2007_v10 }
0x24eb   :  { %v2898_v19 = vpop.eup %2897 }
0x24ec   :  { %v1857_v22 = vmul.f32 %v2898_v19, %v3062_v26  ;;  %v1991_v19 = vld [vmem:[%s3561_s8 + $0x50] sm:$0xff] }
0x24ee   :  { %v1858_v24 = vadd.f32 %v1857_v22, %v3065_v32  ;;  %v1992_v22 = vld [vmem:[%s3561_s8 + $0x58] sm:$0xff] }
0x24f0   :  { %1861 = vrot.lane.b32.xlu0 %v1858_v24, %s2909_s4  ;;  %v1859_v28 = vmul.f32 %v1858_v24, %v1767_v45  ;;  %v2804_v45 = vpack.c.bf16 %v2006_v13, %v2005_v58 }
0x2562   :  { %v1862_v25 = vpop.permute.xlu0 %1861 }
0x2563   :  { %v1864_v27 = vmul.f32 %v1862_v25, %v1858_v24  ;;  %v2009_v25 = vld [vmem:[%s3561_s8 + $0xe0] sm:$0xff] }
0x2565   :  { %1866 = vrot.lane.b32.xlu1 %v1864_v27, %s2910_s30  ;;  %v2010_v27 = vld [vmem:[%s3561_s8 + $0xe8] sm:$0xff] }
0x25d7   :  { %v1867_v29 = vpop.permute.xlu1 %1866 }
0x25d8   :  { %v3375_v59 = vadd.f32 %v1867_v29, %v1859_v28  ;;  %v2812_v28 = vpack.c.bf16 %v2010_v27, %v2009_v25  ;;  %v1993_v29 = vld [vmem:[%s3561_s8 + $0x60] sm:$0xff] }
0x25da   :  { %2899 = vtanh.f32 %v3375_v59 }
0x25e4   :  { %v2900_v30 = vpop.eup %2899 }
0x25e5   :  { %1872 = vrot.lane.b32.xlu0 %v2900_v30, %s2909_s4 }
0x2657   :  { %v1873_v31 = vpop.permute.xlu0 %1872 }
0x2658   :  { %v3379_v33 = vmul.f32 %v1873_v31, %v1858_v24  ;;  %v2810_v24 = vpack.c.bf16 %v1992_v22, %v1991_v19  ;;  %v2011_v31 = vld [vmem:[%s3561_s8 + $0xf0] sm:$0xff] }
0x265a   :  { %1882 = vrot.lane.b32.xlu1 %v3379_v33, %s2910_s30 }
0x26cc   :  { %v1883_v34 = vpop.permute.xlu1 %1882 }
0x26cd   :  { %2658 = vmatmul.mubr.msk.f32.vlgmr.msra.gmra.mrb[22].mxu1 %vm214_vm6, %v1883_v34  ;;  %v2012_v34 = vld [vmem:[%s3561_s8 + $0xf8] sm:$0xff] }
0x26ce   :  { %2681 = vmatprep.mubr.msk.f32.mxu1 %vm2906_vm2, %v2907_v14 }
0x27a0   :  { %v1952_v35 = vpop.f32.mrb[22].mxu1 }
0x27a1   :  { %v1956_v36 = vadd.f32 %v1952_v35, %v1164_v42  ;;  %v2659_v38 = vpop.f32.mrb[23].mxu1  ;;  %v1995_v42 = vld [vmem:[%s3561_s8 + $0x70] sm:$0xff]  ;;  %v2816_v35 = vpack.c.bf16 %v2012_v34, %v2011_v31 }
0x27a3   :  { %v1957_v39 = vmul.f32 %v1956_v36, %v3062_v26  ;;  %v1996_v36 = vld [vmem:[%s3561_s8 + $0x78] sm:$0xff] }
0x27a4   :  { %v2818_v38 = vpack.c.bf16 %v1996_v36, %v1995_v42 }
0x27a5   :  { %2901 = vtanh.f32 %v1957_v39 }
0x27af   :  { %v2902_v41 = vpop.eup %2901 }
0x27b0   :  { %v1959_v44 = vmul.f32 %v2902_v41, %v3062_v26  ;;  %v2170_v41 = vld [vmem:[%s3563_s11] sm:$0xff] }
0x27b2   :  { %v3391_v46 = vadd.f32 %v1959_v44, %v3065_v32  ;;  %v2171_v44 = vld [vmem:[%s3563_s11 + $0x8] sm:$0xff] }
0x27b4   :  { %1963 = vrot.lane.b32.xlu0 %v3391_v46, %s2909_s4  ;;  %v1961_v21 = vmul.f32 %v3391_v46, %v3375_v59  ;;  %v1994_v59 = vld [vmem:[%s3561_s8 + $0x68] sm:$0xff] }
0x27b5   :  { %v2814_v30 = vpack.c.bf16 %v1994_v59, %v1993_v29 }
0x27b8   :  { %1775 = vrot.lane.b32.xlu0 %v1773_v20, %s2909_s4  ;;  %v2806_v20 = vpack.c.bf16 %v1990_v17, %v1989_v9 }
0x27bc   :  { %1369 = vrot.lane.b32.xlu0 %v3290_v62, %s2909_s4  ;;  %v1997_v62 = vld [vmem:[%s3561_s8 + $0x80] sm:$0xff] }
0x27c0   :  { %1472 = vrot.lane.b32.xlu0 %v3309_v12, %s2911_s7  ;;  %v1998_v12 = vld [vmem:[%s3561_s8 + $0x88] sm:$0xff] }
0x27c1   :  { %v2788_v23 = vpack.c.bf16 %v1998_v12, %v1997_v62  ;;  %v2664_v62 = vpop.f32.mrb[25].mxu0 }
0x27c3   :  { %2789 = vmatprep.subr.bf16.mxu0 %v2788_v23 }
0x27c4   :  { %2791 = vmatpush3.bf16.msra.mxu0 %v2790_v51  ;;  %v2175_v51 = vld [vmem:[%s3563_s11 + $0x28] sm:$0xff] }
0x27c5   :  { %2793 = vmatprep.subr.bf16.mxu0 %v2792_v47  ;;  %v2827_v52 = vpack.c.bf16 %v2175_v51, %v2174_v50 }
0x27c8   :  { %2795 = vmatpush3.bf16.msra.mxu0 %v2794_v61 }
0x27c9   :  { %2797 = vmatprep.subr.bf16.mxu0 %v2796_v63  ;;  %v2301_v63 = vld [vmem:[%s3565_s12] ss:$0 sm:$0xff] }
0x27cc   :  { %2799 = vmatpush3.bf16.msra.mxu0 %v2798_v56 }
0x27cd   :  { %2801 = vmatprep.subr.bf16.mxu0 %v2800_v4 }
0x2826   :  { %v1964_v14 = vpop.permute.xlu0 %1963 }
0x2827   :  { %v1966_v3 = vmul.f32 %v1964_v14, %v3391_v46  ;;  %v2172_v14 = vld [vmem:[%s3563_s11 + $0x10] sm:$0xff] }
0x2829   :  { %1968 = vrot.lane.b32.xlu1 %v1966_v3, %s2910_s30  ;;  %v2821_v3 = vpack.c.bf16 %v2171_v44, %v2170_v41 }
0x282a   :  { %v1776_v26 = vpop.permute.xlu0 %1775 }
0x282b   :  { %1778 = vst.msk [vmem:[#allocation4 + $0x8] sm:$0xff] %vm1372_vm7, %v1776_v26  ;;  %v2173_v26 = vld [vmem:[%s3563_s11 + $0x18] sm:$0xff]  ;;  %2822 = vmatpush3.bf16.msra.mxu1 %v2821_v3 }
0x282c   :  { %2823 = vmatprep.subr.bf16.mxu1 %v2905_v8 }
0x282e   :  { %v1370_v32 = vpop.permute.xlu0 %1369 }
0x282f   :  { %1373 = vst.msk [vmem:[#allocation4] sm:$0xff] %vm1372_vm7, %v1370_v32  ;;  %v2824_v32 = vpack.c.bf16 %v2173_v26, %v2172_v14 }
0x2831   :  { %2825 = vmatpush3.bf16.msra.mxu1 %v2824_v32 }
0x2832   :  { %v1473_v60 = vpop.permute.xlu0 %1472  ;;  %2826 = vmatprep.subr.bf16.mxu1 %v2905_v8 }
0x2833   :  { %1476 = vst.msk [vmem:[#allocation4] sm:$0xff] %vm1475_vm8, %v1473_v60 }
0x2834   :  { %1575 = vst.msk [vmem:[#allocation4] sm:$0xff] %vm1574_vm9, %v3328_v37  ;;  %v1988_v37 = vld [vmem:[%s3561_s8 + $0x38] sm:$0xff] }
0x2835   :  { %v2802_v7 = vpack.c.bf16 %v1988_v37, %v1987_v5  ;;  %2828 = vmatpush3.bf16.msra.mxu1 %v2827_v52 }
0x2836   :  { %2829 = vmatprep.subr.bf16.mxu1 %v2905_v8 }
0x2837   :  { %2803 = vmatpush3.bf16.msra.mxu0 %v2802_v7 }
0x2838   :  { %2805 = vmatprep.subr.bf16.mxu0 %v2804_v45 }
0x283b   :  { %2807 = vmatpush3.bf16.msra.mxu0 %v2806_v20 }
0x283c   :  { %2809 = vmatprep.subr.bf16.mxu0 %v2808_v16 }
0x283f   :  { %2811 = vmatpush3.bf16.msra.mxu0 %v2810_v24 }
0x2840   :  { %2813 = vmatprep.subr.bf16.mxu0 %v2812_v28 }
0x2843   :  { %2815 = vmatpush3.bf16.msra.mxu0 %v2814_v30 }
0x2844   :  { %2817 = vmatprep.subr.bf16.mxu0 %v2816_v35 }
0x2847   :  { %2819 = vmatpush3.bf16.msra.mxu0 %v2818_v38 }
0x289b   :  { %v1969_v43 = vpop.permute.xlu1 %1968 }
0x289c   :  { %v1971_v15 = vadd.f32 %v1969_v43, %v1961_v21 }
0x289e   :  { %2903 = vtanh.f32 %v1971_v15 }
0x28a8   :  { %v2904_v39 = vpop.eup %2903 }
0x28a9   :  { %1974 = vrot.lane.b32.xlu1 %v2904_v39, %s2909_s4 }
0x28ad   :  { %1877 = vrot.lane.b32.xlu1 %v3379_v33, %s2911_s7  ;;  %v1979_v33 = vld [vmem:[#allocation4] sm:$0xff] }
0x291b   :  { %v1975_v12 = vpop.permute.xlu1 %1974 }
0x291c   :  { %v1977_v23 = vmul.f32 %v1975_v12, %v3391_v46  ;;  %v2176_v46 = vld [vmem:[%s3563_s11 + $0x30] sm:$0xff] }
0x291d   :  { %v2830_v53 = vpack.c.bf16 %v2177_v40, %v2176_v46 }
0x291f   :  { %v1878_v48 = vpop.permute.xlu1 %1877  ;;  %2831 = vmatpush3.bf16.msra.mxu1 %v2830_v53 }
0x2920   :  { %1880 = vst.msk [vmem:[#allocation4 + $0x8] sm:$0xff] %vm1475_vm8, %v1878_v48 }
0x2921   :  { %1978 = vst.msk [vmem:[#allocation4 + $0x8] sm:$0xff] %vm1574_vm9, %v1977_v23 }
0x2928   :  { %v1980_v49 = vld [vmem:[#allocation4 + $0x8] sm:$0xff] }
0x2929   :  { %2155 = vmatprep.mubr.f32.mxu0 %v1980_v49 }
0x292a   :  { %2156 = vmatmul.mubr.f32.vlgmr.msra.gmra.mrb[26].mxu0 %v1979_v33 }
0x29fd   :  { %v2438_v47 = vpop.f32.mrb[26].mxu0 }
0x29fe   :  { %v2439_v54 = vpop.f32.mrb[27].mxu0 }
0x29ff   :  { %v2440_v55 = vadd.f32 %v2439_v54, %v2438_v47 }
0x2a01   :  { %v2158_v60 = vadd.f32 %v2440_v55, %v2087_v18 }
0x2a03   :  { %v2168_v61 = vadd.f32 %v2300_v57, %v2158_v60 }
0x2a05   :  { %v2169_v8 = vmax.f32 %v2168_v61, 0.0 }
0x2a07   :  { %2682 = vmatmul.mubr.msk.f32.vlgmr.msra.gmra.mrb[24].mxu1 %vm2185_vm10, %v2169_v8 }
0x2ada   :  { %v2255_v0 = vpop.f32.mrb[24].mxu1 }
0x2adb   :  { %v2256_v1 = vadd.f32 %v2301_v63, %v2255_v0  ;;  %v2683_v2 = vpop.f32.mrb[25].mxu1 }
0x2add   :  { %2260 = vst.msk [vmem:[%s3566_s13] sm:$0xff] %vm2259_vm11, %v2256_v1 }

</bundles_post_ra>
